<compile_context>
chip_gen: v7x
topology: tpu7x:2x2x1
jax: 0.10.0
libtpu: 0.0.40
codegen_flags: <defaults>
</compile_context>

<pallas_src>
import functools

import jax
import jax.numpy as jnp
from jax.experimental import pallas as pl
from jax.experimental.pallas import tpu as pltpu


HEAD_LANES = 128                  # packed head output width (lane-dense store)
HEAD_HALF = HEAD_LANES // 2       # impact -> lanes [0,64), likelihood -> [64,128)
VMEM_LIMIT = 32 * 1024 * 1024     # well under 64 MiB/TC on v7x; fine on v5e/v6e
SMALL_FUSED_MAX_NPAD = 512        # single fused kernel at/below this node count
NEG_LARGE = -1e30                 # pad-lane bias; must remain f32 (bf16 -> -inf/NaN)


def _round_up(x, m):
    return (x + m - 1) // m * m


def _pick_tile(npad, cap):
    """Largest candidate tile <= cap that divides npad (npad % 128 == 0)."""
    for t in (1024, 768, 512, 384, 256, 128):
        if t <= min(npad, cap) and npad % t == 0:
            return t
    return 128


def _dual_log_softmax(z):
    """log_softmax over lanes [0,64) and [64,128) independently, full width.

    Uses lane-masked reductions so no vreg is split at the half-lane boundary
    and the store stays a single lane-dense (rows, 128) write.
    """
    lane = jax.lax.broadcasted_iota(jnp.int32, z.shape, z.ndim - 1)
    is_lo = lane < HEAD_HALF
    neg = jnp.float32(NEG_LARGE)
    m_lo = jnp.max(jnp.where(is_lo, z, neg), axis=-1, keepdims=True)
    m_hi = jnp.max(jnp.where(is_lo, neg, z), axis=-1, keepdims=True)
    m = jnp.where(is_lo, m_lo, m_hi)
    e = jnp.exp(z - m)                                   # pad lanes underflow to 0
    s_lo = jnp.sum(jnp.where(is_lo, e, 0.0), axis=-1, keepdims=True)
    s_hi = jnp.sum(jnp.where(is_lo, 0.0, e), axis=-1, keepdims=True)
    s = jnp.where(is_lo, s_lo, s_hi)
    return z - m - jnp.log(s)


# ----------------------------- Pallas kernels -------------------------------

def transform_kernel(x_ref, w_ref, dinv_ref, o_ref):
    """Hs = dinv * (X @ W1)  (layer-1 features pre-scaled by D^{-1/2}[src])."""
    xw = jnp.dot(x_ref[...], w_ref[...], preferred_element_type=jnp.float32)
    o_ref[...] = (dinv_ref[...] * xw).astype(o_ref.dtype)


def aggregate1_kernel(a_ref, h_ref, dinv_ref, b1_ref, w2_ref, o_ref, acc_ref,
                      *, tile_k):
    """acc += (A+I)[rows, k-chunk] @ Hs[k-chunk]; epilogue fuses:
       h1 = relu(dinv*acc + b1);  out = dinv * (h1 @ W2)   (layer-2 scaled H).
    """
    k = pl.program_id(1)

    @pl.when(k == 0)
    def _():
        acc_ref[...] = jnp.zeros_like(acc_ref)

    start = pl.multiple_of(k * tile_k, tile_k)
    acc_ref[...] += jnp.dot(a_ref[...], h_ref[pl.ds(start, tile_k), :],
                            preferred_element_type=jnp.float32)

    @pl.when(k == pl.num_programs(1) - 1)
    def _():
        dinv = dinv_ref[...]
        h1 = jnp.maximum(dinv * acc_ref[...] + b1_ref[...], 0.0)
        # dropout (eval) = identity
        h1w2 = jnp.dot(h1.astype(jnp.bfloat16), w2_ref[...],
                       preferred_element_type=jnp.float32)
        o_ref[...] = (dinv * h1w2).astype(o_ref.dtype)


def aggregate2_heads_kernel(a_ref, h_ref, dinv_ref, b2_ref, wh_ref, bh_ref,
                            o_ref, acc_ref, *, tile_k):
    """Second aggregation fused with the packed impact|likelihood heads."""
    k = pl.program_id(1)

    @pl.when(k == 0)
    def _():
        acc_ref[...] = jnp.zeros_like(acc_ref)

    start = pl.multiple_of(k * tile_k, tile_k)
    acc_ref[...] += jnp.dot(a_ref[...], h_ref[pl.ds(start, tile_k), :],
                            preferred_element_type=jnp.float32)

    @pl.when(k == pl.num_programs(1) - 1)
    def _():
        h2 = jnp.maximum(dinv_ref[...] * acc_ref[...] + b2_ref[...], 0.0)
        # dropout (eval) = identity; padded class lanes carry bias -1e30 so
        # they vanish in the per-half log_softmax.
        z = jnp.dot(h2.astype(jnp.bfloat16), wh_ref[...],
                    preferred_element_type=jnp.float32) + bh_ref[...]
        o_ref[...] = _dual_log_softmax(z)


def fused_small_kernel(x_ref, a_ref, dinv_ref, w1_ref, b1_ref, w2_ref, b2_ref,
                       wh_ref, bh_ref, o_ref):
    """Whole forward (both GCN layers + heads) in one call for small graphs."""
    dinv = dinv_ref[...]
    a = a_ref[...]
    hs = (dinv * jnp.dot(x_ref[...], w1_ref[...],
                         preferred_element_type=jnp.float32)).astype(jnp.bfloat16)
    h1 = jnp.maximum(
        dinv * jnp.dot(a, hs, preferred_element_type=jnp.float32) + b1_ref[...],
        0.0)
    h2s = (dinv * jnp.dot(h1.astype(jnp.bfloat16), w2_ref[...],
                          preferred_element_type=jnp.float32)).astype(jnp.bfloat16)
    h2 = jnp.maximum(
        dinv * jnp.dot(a, h2s, preferred_element_type=jnp.float32) + b2_ref[...],
        0.0)
    z = jnp.dot(h2.astype(jnp.bfloat16), wh_ref[...],
                preferred_element_type=jnp.float32) + bh_ref[...]
    o_ref[...] = _dual_log_softmax(z)


# --------------------------- pallas_call wrappers ----------------------------

def _transform(x_b, w_b, dinv, tile_m):
    npad, fpad = x_b.shape
    hpad = w_b.shape[1]
    return pl.pallas_call(
        transform_kernel,
        out_shape=jax.ShapeDtypeStruct((npad, hpad), jnp.bfloat16),
        grid_spec=pltpu.PrefetchScalarGridSpec(
            num_scalar_prefetch=0,
            grid=(npad // tile_m,),
            in_specs=[pl.BlockSpec((tile_m, fpad), lambda i: (i, 0)),
                      pl.BlockSpec((fpad, hpad), lambda i: (0, 0)),
                      pl.BlockSpec((tile_m, 1), lambda i: (i, 0))],
            out_specs=pl.BlockSpec((tile_m, hpad), lambda i: (i, 0))),
        compiler_params=pltpu.CompilerParams(
            dimension_semantics=("parallel",),
            vmem_limit_bytes=VMEM_LIMIT),
        cost_estimate=pl.CostEstimate(
            flops=2 * npad * fpad * hpad, transcendentals=0,
            bytes_accessed=2 * (x_b.size + w_b.size + npad * hpad)),
    )(x_b, w_b, dinv)


def _aggregate1(a_b, h_b, dinv, b1, w2, tile_m, tile_k):
    npad = a_b.shape[0]
    hpad = h_b.shape[1]
    return pl.pallas_call(
        functools.partial(aggregate1_kernel, tile_k=tile_k),
        out_shape=jax.ShapeDtypeStruct((npad, hpad), jnp.bfloat16),
        grid_spec=pltpu.PrefetchScalarGridSpec(
            num_scalar_prefetch=0,
            grid=(npad // tile_m, npad // tile_k),
            in_specs=[pl.BlockSpec((tile_m, tile_k), lambda i, k: (i, k)),
                      # H kept fully VMEM-resident (constant block index).
                      pl.BlockSpec((npad, hpad), lambda i, k: (0, 0)),
                      pl.BlockSpec((tile_m, 1), lambda i, k: (i, 0)),
                      pl.BlockSpec((1, hpad), lambda i, k: (0, 0)),
                      pl.BlockSpec((hpad, hpad), lambda i, k: (0, 0))],
            out_specs=pl.BlockSpec((tile_m, hpad), lambda i, k: (i, 0)),
            scratch_shapes=[pltpu.VMEM((tile_m, hpad), jnp.float32)]),
        compiler_params=pltpu.CompilerParams(
            dimension_semantics=("parallel", "arbitrary"),
            vmem_limit_bytes=VMEM_LIMIT),
        cost_estimate=pl.CostEstimate(
            flops=2 * npad * npad * hpad + 2 * npad * hpad * hpad,
            transcendentals=0,
            bytes_accessed=2 * (a_b.size + h_b.size + npad * hpad)),
    )(a_b, h_b, dinv, b1, w2)


def _aggregate2_heads(a_b, h_b, dinv, b2, w_heads, b_heads, tile_m, tile_k):
    npad = a_b.shape[0]
    hpad = h_b.shape[1]
    return pl.pallas_call(
        functools.partial(aggregate2_heads_kernel, tile_k=tile_k),
        out_shape=jax.ShapeDtypeStruct((npad, HEAD_LANES), jnp.float32),
        grid_spec=pltpu.PrefetchScalarGridSpec(
            num_scalar_prefetch=0,
            grid=(npad // tile_m, npad // tile_k),
            in_specs=[pl.BlockSpec((tile_m, tile_k), lambda i, k: (i, k)),
                      pl.BlockSpec((npad, hpad), lambda i, k: (0, 0)),
                      pl.BlockSpec((tile_m, 1), lambda i, k: (i, 0)),
                      pl.BlockSpec((1, hpad), lambda i, k: (0, 0)),
                      pl.BlockSpec((hpad, HEAD_LANES), lambda i, k: (0, 0)),
                      pl.BlockSpec((1, HEAD_LANES), lambda i, k: (0, 0))],
            out_specs=pl.BlockSpec((tile_m, HEAD_LANES), lambda i, k: (i, 0)),
            scratch_shapes=[pltpu.VMEM((tile_m, hpad), jnp.float32)]),
        compiler_params=pltpu.CompilerParams(
            dimension_semantics=("parallel", "arbitrary"),
            vmem_limit_bytes=VMEM_LIMIT),
        cost_estimate=pl.CostEstimate(
            flops=2 * npad * npad * hpad + 2 * npad * hpad * HEAD_LANES,
            transcendentals=npad * (HEAD_LANES + 2),
            bytes_accessed=2 * (a_b.size + h_b.size) + 4 * npad * HEAD_LANES),
    )(a_b, h_b, dinv, b2, w_heads, b_heads)


def _fused_small(x_b, a_b, dinv, w1, b1, w2, b2, w_heads, b_heads):
    npad, fpad = x_b.shape
    hpad = w1.shape[1]
    return pl.pallas_call(
        fused_small_kernel,
        out_shape=jax.ShapeDtypeStruct((npad, HEAD_LANES), jnp.float32),
        grid_spec=pltpu.PrefetchScalarGridSpec(
            num_scalar_prefetch=0,
            grid=(1,),
            in_specs=[pl.BlockSpec((npad, fpad), lambda i: (0, 0)),
                      pl.BlockSpec((npad, npad), lambda i: (0, 0)),
                      pl.BlockSpec((npad, 1), lambda i: (0, 0)),
                      pl.BlockSpec((fpad, hpad), lambda i: (0, 0)),
                      pl.BlockSpec((1, hpad), lambda i: (0, 0)),
                      pl.BlockSpec((hpad, hpad), lambda i: (0, 0)),
                      pl.BlockSpec((1, hpad), lambda i: (0, 0)),
                      pl.BlockSpec((hpad, HEAD_LANES), lambda i: (0, 0)),
                      pl.BlockSpec((1, HEAD_LANES), lambda i: (0, 0))],
            out_specs=pl.BlockSpec((npad, HEAD_LANES), lambda i: (0, 0))),
        compiler_params=pltpu.CompilerParams(
            dimension_semantics=("arbitrary",),
            vmem_limit_bytes=VMEM_LIMIT),
    )(x_b, a_b, dinv, w1, b1, w2, b2, w_heads, b_heads)


# ------------------------------ JAX glue / wrapper ---------------------------

def build_adjacency_and_dinv(edge_index, num_nodes, npad):
    """A+I (bf16, padded, UN-normalized) and D^{-1/2} as an [npad, 1] f32 vec.

    Normalization is applied inside the kernels as per-row vector scales, so
    no extra dense O(N^2) normalization pass is done here.
    """
    ei = jnp.clip(edge_index, 0, num_nodes - 1)
    src, dst = ei[0], ei[1]
    idx = jnp.arange(npad)
    self_loop = (idx < num_nodes).astype(jnp.float32)

    adj = jnp.zeros((npad, npad), jnp.bfloat16)
    adj = adj.at[dst, src].add(jnp.ones(src.shape, jnp.bfloat16))   # src -> dst
    adj = adj.at[idx, idx].add(self_loop.astype(jnp.bfloat16))      # self loops

    deg = jnp.zeros((npad,), jnp.float32).at[dst].add(1.0) + self_loop
    dinv = jnp.where(deg > 0, jax.lax.rsqrt(deg), 0.0).reshape(npad, 1)
    return adj, dinv


@jax.jit
def _forward_jit(x, edge_index, params):
    n, f = x.shape
    hidden = params["w1"].shape[1]
    num_classes = params["wi"].shape[1]
    assert num_classes <= HEAD_HALF

    npad = _round_up(max(n, 8), 128)
    fpad = _round_up(f, 128)
    hpad = _round_up(hidden, 128)

    # Zero-padded bf16 operands for the MXU path; biases stay f32.
    x_p = jnp.zeros((npad, fpad), jnp.bfloat16).at[:n, :f].set(
        x.astype(jnp.bfloat16))
    w1 = jnp.zeros((fpad, hpad), jnp.bfloat16).at[:f, :hidden].set(
        params["w1"].astype(jnp.bfloat16))
    b1 = jnp.zeros((1, hpad), jnp.float32).at[:, :hidden].set(params["b1"])
    w2 = jnp.zeros((hpad, hpad), jnp.bfloat16).at[:hidden, :hidden].set(
        params["w2"].astype(jnp.bfloat16))
    b2 = jnp.zeros((1, hpad), jnp.float32).at[:, :hidden].set(params["b2"])

    # Fused heads: impact -> lanes [0, C), likelihood -> lanes [64, 64+C).
    w_heads = jnp.zeros((hpad, HEAD_LANES), jnp.bfloat16)
    w_heads = w_heads.at[:hidden, :num_classes].set(
        params["wi"].astype(jnp.bfloat16))
    w_heads = w_heads.at[:hidden, HEAD_HALF:HEAD_HALF + num_classes].set(
        params["wl"].astype(jnp.bfloat16))
    b_heads = jnp.full((1, HEAD_LANES), NEG_LARGE, jnp.float32)  # kill pad lanes
    b_heads = b_heads.at[:, :num_classes].set(params["bi"])
    b_heads = b_heads.at[:, HEAD_HALF:HEAD_HALF + num_classes].set(params["bl"])

    adj, dinv = build_adjacency_and_dinv(edge_index, n, npad)

    if npad <= SMALL_FUSED_MAX_NPAD:
        # Small-graph fast path: whole forward in a single pallas_call.
        out = _fused_small(x_p, adj, dinv, w1, b1, w2, b2, w_heads, b_heads)
    else:
        # Keep >= 2 row tiles so v7x's 2 TensorCores both get work.
        tile_m = _pick_tile(npad, cap=min(1024, max(128, npad // 2)))
        tile_k = _pick_tile(npad, cap=1024)
        hs = _transform(x_p, w1, dinv, tile_m)                    # dinv*(X@W1)
        h2s = _aggregate1(adj, hs, dinv, b1, w2, tile_m, tile_k)  # layer1 + @W2
        out = _aggregate2_heads(adj, h2s, dinv, b2, w_heads, b_heads,
                                tile_m, tile_k)                   # layer2+heads

    impact = out[:n, :num_classes]
    likelihood = out[:n, HEAD_HALF:HEAD_HALF + num_classes]
    return impact, likelihood


def risk_analyzer_gcn_forward(x, edge_index, params):
    """Forward pass. x: [N, input_dim] f32, edge_index: [2, E] int32."""
    return _forward_jit(x, edge_index, params)


def init_params(key, input_dim, hidden_dim=64, num_classes=6):
    """Deterministic synthetic parameters (stored pre-transposed: [in, out])."""
    ks = jax.random.split(key, 8)

    def lin(kw, fan_in, fan_out):
        scale = 1.0 / jnp.sqrt(jnp.float32(fan_in))
        return jax.random.uniform(kw, (fan_in, fan_out), jnp.float32,
                                  minval=-scale, maxval=scale)

    return {
        "w1": lin(ks[0], input_dim, hidden_dim),
        "b1": jax.random.normal(ks[1], (1, hidden_dim), jnp.float32) * 0.01,
        "w2": lin(ks[2], hidden_dim, hidden_dim),
        "b2": jax.random.normal(ks[3], (1, hidden_dim), jnp.float32) * 0.01,
        "wi": lin(ks[4], hidden_dim, num_classes),
        "bi": jax.random.normal(ks[5], (1, num_classes), jnp.float32) * 0.01,
        "wl": lin(ks[6], hidden_dim, num_classes),
        "bl": jax.random.normal(ks[7], (1, num_classes), jnp.float32) * 0.01,
    }


def _reference_forward(x, edge_index, params):
    """Pure-JAX f32 reference of the PyTorch module (for sanity checking)."""
    n = x.shape[0]
    ei = jnp.clip(edge_index, 0, n - 1)
    adj = jnp.zeros((n, n), jnp.float32).at[ei[1], ei[0]].add(1.0) + jnp.eye(n)
    deg = adj.sum(1)
    dinv = jnp.where(deg > 0, 1.0 / jnp.sqrt(deg), 0.0)
    a = dinv[:, None] * adj * dinv[None, :]
    h = jax.nn.relu(a @ (x @ params["w1"]) + params["b1"])
    h = jax.nn.relu(a @ (h @ params["w2"]) + params["b2"])
    zi = h @ params["wi"] + params["bi"]
    zl = h @ params["wl"] + params["bl"]
    return jax.nn.log_softmax(zi, axis=-1), jax.nn.log_softmax(zl, axis=-1)


if __name__ == "__main__":
    key = jax.random.PRNGKey(0)
    k_x, k_e, k_p = jax.random.split(key, 3)

    num_nodes, input_dim, hidden_dim, num_classes = 8, 16, 32, 6
    num_edges = 12

    x = jax.random.normal(k_x, (num_nodes, input_dim), jnp.float32)
    edge_index = jax.random.randint(k_e, (2, num_edges), 0, num_nodes,
                                    dtype=jnp.int32)
    params = init_params(k_p, input_dim, hidden_dim, num_classes)

    impact, likelihood = risk_analyzer_gcn_forward(x, edge_index, params)
    jax.block_until_ready((impact, likelihood))

    assert impact.shape == (num_nodes, num_classes)
    assert likelihood.shape == (num_nodes, num_classes)

    # log-probs must exponentiate to valid distributions
    assert bool(jnp.allclose(jnp.exp(impact).sum(-1), 1.0, atol=1e-3))
    assert bool(jnp.allclose(jnp.exp(likelihood).sum(-1), 1.0, atol=1e-3))

    # loose check vs. f32 reference (bf16 MXU path introduces ~1e-2 error)
    ref_i, ref_l = _reference_forward(x, edge_index, params)
    assert bool(jnp.allclose(impact, ref_i, atol=0.1))
    assert bool(jnp.allclose(likelihood, ref_l, atol=0.1))

    print("KERNEL_OK")
</pallas_src>

<mosaic_0001>
module attributes {stable_mosaic.version = 11 : i64} {
  func.func @fused_small_kernel(%arg0: i32, %arg1: memref<128x128xbf16, #tpu.memory_space<vmem>>, %arg2: memref<128x128xbf16, #tpu.memory_space<vmem>>, %arg3: memref<128x1xf32, #tpu.memory_space<vmem>>, %arg4: memref<128x128xbf16, #tpu.memory_space<vmem>>, %arg5: memref<1x128xf32, #tpu.memory_space<vmem>>, %arg6: memref<128x128xbf16, #tpu.memory_space<vmem>>, %arg7: memref<1x128xf32, #tpu.memory_space<vmem>>, %arg8: memref<128x128xbf16, #tpu.memory_space<vmem>>, %arg9: memref<1x128xf32, #tpu.memory_space<vmem>>, %arg10: memref<128x128xf32, #tpu.memory_space<vmem>>) attributes {dimension_semantics = [#tpu.dimension_semantics<arbitrary>], iteration_bounds = array<i64: 1>, scalar_prefetch = 0 : i64, scratch_operands = 0 : i64, tpu.core_type = #tpu.core_type<tc>, window_params = [{pipeline_mode = #tpu.pipeline_mode<synchronous>, transform_indices = @transform_0, window_bounds = array<i64: 128, 128>}, {pipeline_mode = #tpu.pipeline_mode<synchronous>, transform_indices = @transform_1, window_bounds = array<i64: 128, 128>}, {pipeline_mode = #tpu.pipeline_mode<synchronous>, transform_indices = @transform_2, window_bounds = array<i64: 128, 1>}, {pipeline_mode = #tpu.pipeline_mode<synchronous>, transform_indices = @transform_3, window_bounds = array<i64: 128, 128>}, {pipeline_mode = #tpu.pipeline_mode<synchronous>, transform_indices = @transform_4, window_bounds = array<i64: 1, 128>}, {pipeline_mode = #tpu.pipeline_mode<synchronous>, transform_indices = @transform_5, window_bounds = array<i64: 128, 128>}, {pipeline_mode = #tpu.pipeline_mode<synchronous>, transform_indices = @transform_6, window_bounds = array<i64: 1, 128>}, {pipeline_mode = #tpu.pipeline_mode<synchronous>, transform_indices = @transform_7, window_bounds = array<i64: 128, 128>}, {pipeline_mode = #tpu.pipeline_mode<synchronous>, transform_indices = @transform_8, window_bounds = array<i64: 1, 128>}, {pipeline_mode = #tpu.pipeline_mode<synchronous>, transform_indices = @transform_9, window_bounds = array<i64: 128, 128>}]} {
    %c0 = arith.constant 0 : index
    %c0_0 = arith.constant 0 : index
    %0 = vector.load %arg3[%c0, %c0_0] : memref<128x1xf32, #tpu.memory_space<vmem>>, vector<128x1xf32>
    %c0_1 = arith.constant 0 : index
    %c0_2 = arith.constant 0 : index
    %1 = vector.load %arg2[%c0_1, %c0_2] : memref<128x128xbf16, #tpu.memory_space<vmem>>, vector<128x128xbf16>
    %c0_3 = arith.constant 0 : index
    %c0_4 = arith.constant 0 : index
    %2 = vector.load %arg1[%c0_3, %c0_4] : memref<128x128xbf16, #tpu.memory_space<vmem>>, vector<128x128xbf16>
    %c0_5 = arith.constant 0 : index
    %c0_6 = arith.constant 0 : index
    %3 = vector.load %arg4[%c0_5, %c0_6] : memref<128x128xbf16, #tpu.memory_space<vmem>>, vector<128x128xbf16>
    %cst = arith.constant dense<0.000000e+00> : vector<128x128xf32>
    %4 = tpu.matmul %2, %3, %cst {dimension_numbers = #tpu.dot_dimension_numbers<[1], [0], [0], [1], [0, 0, 1, 1], [], []>} : vector<128x128xbf16>, vector<128x128xbf16>, vector<128x128xf32> -> vector<128x128xf32>
    %5 = vector.broadcast %0 : vector<128x1xf32> to vector<128x128xf32>
    %6 = arith.mulf %5, %4 : vector<128x128xf32>
    %7 = arith.truncf %6 : vector<128x128xf32> to vector<128x128xbf16>
    %cst_7 = arith.constant dense<0.000000e+00> : vector<128x128xf32>
    %8 = tpu.matmul %1, %7, %cst_7 {dimension_numbers = #tpu.dot_dimension_numbers<[1], [0], [0], [1], [0, 0, 1, 1], [], []>} : vector<128x128xbf16>, vector<128x128xbf16>, vector<128x128xf32> -> vector<128x128xf32>
    %9 = vector.broadcast %0 : vector<128x1xf32> to vector<128x128xf32>
    %10 = arith.mulf %9, %8 : vector<128x128xf32>
    %c0_8 = arith.constant 0 : index
    %c0_9 = arith.constant 0 : index
    %11 = vector.load %arg5[%c0_8, %c0_9] : memref<1x128xf32, #tpu.memory_space<vmem>>, vector<1x128xf32>
    %12 = vector.broadcast %11 : vector<1x128xf32> to vector<128x128xf32>
    %13 = arith.addf %10, %12 : vector<128x128xf32>
    %cst_10 = arith.constant 0.000000e+00 : f32
    %14 = vector.broadcast %cst_10 : f32 to vector<128x128xf32>
    %15 = arith.maximumf %13, %14 : vector<128x128xf32>
    %16 = arith.truncf %15 : vector<128x128xf32> to vector<128x128xbf16>
    %c0_11 = arith.constant 0 : index
    %c0_12 = arith.constant 0 : index
    %17 = vector.load %arg6[%c0_11, %c0_12] : memref<128x128xbf16, #tpu.memory_space<vmem>>, vector<128x128xbf16>
    %cst_13 = arith.constant dense<0.000000e+00> : vector<128x128xf32>
    %18 = tpu.matmul %16, %17, %cst_13 {dimension_numbers = #tpu.dot_dimension_numbers<[1], [0], [0], [1], [0, 0, 1, 1], [], []>} : vector<128x128xbf16>, vector<128x128xbf16>, vector<128x128xf32> -> vector<128x128xf32>
    %19 = vector.broadcast %0 : vector<128x1xf32> to vector<128x128xf32>
    %20 = arith.mulf %19, %18 : vector<128x128xf32>
    %21 = arith.truncf %20 : vector<128x128xf32> to vector<128x128xbf16>
    %cst_14 = arith.constant dense<0.000000e+00> : vector<128x128xf32>
    %22 = tpu.matmul %1, %21, %cst_14 {dimension_numbers = #tpu.dot_dimension_numbers<[1], [0], [0], [1], [0, 0, 1, 1], [], []>} : vector<128x128xbf16>, vector<128x128xbf16>, vector<128x128xf32> -> vector<128x128xf32>
    %23 = vector.broadcast %0 : vector<128x1xf32> to vector<128x128xf32>
    %24 = arith.mulf %23, %22 : vector<128x128xf32>
    %c0_15 = arith.constant 0 : index
    %c0_16 = arith.constant 0 : index
    %25 = vector.load %arg7[%c0_15, %c0_16] : memref<1x128xf32, #tpu.memory_space<vmem>>, vector<1x128xf32>
    %26 = vector.broadcast %25 : vector<1x128xf32> to vector<128x128xf32>
    %27 = arith.addf %24, %26 : vector<128x128xf32>
    %cst_17 = arith.constant 0.000000e+00 : f32
    %28 = vector.broadcast %cst_17 : f32 to vector<128x128xf32>
    %29 = arith.maximumf %27, %28 : vector<128x128xf32>
    %30 = arith.truncf %29 : vector<128x128xf32> to vector<128x128xbf16>
    %c0_18 = arith.constant 0 : index
    %c0_19 = arith.constant 0 : index
    %31 = vector.load %arg8[%c0_18, %c0_19] : memref<128x128xbf16, #tpu.memory_space<vmem>>, vector<128x128xbf16>
    %cst_20 = arith.constant dense<0.000000e+00> : vector<128x128xf32>
    %32 = tpu.matmul %30, %31, %cst_20 {dimension_numbers = #tpu.dot_dimension_numbers<[1], [0], [0], [1], [0, 0, 1, 1], [], []>} : vector<128x128xbf16>, vector<128x128xbf16>, vector<128x128xf32> -> vector<128x128xf32>
    %c0_21 = arith.constant 0 : index
    %c0_22 = arith.constant 0 : index
    %33 = vector.load %arg9[%c0_21, %c0_22] : memref<1x128xf32, #tpu.memory_space<vmem>>, vector<1x128xf32>
    %34 = vector.broadcast %33 : vector<1x128xf32> to vector<128x128xf32>
    %35 = arith.addf %32, %34 : vector<128x128xf32>
    %36 = tpu.iota {dimensions = array<i32: 1>} : vector<128x128xi32>
    %c64_i32 = arith.constant 64 : i32
    %37 = vector.broadcast %c64_i32 : i32 to vector<128x128xi32>
    %38 = arith.cmpi slt, %36, %37 : vector<128x128xi32>
    %cst_23 = arith.constant -1.000000e+30 : f32
    %39 = vector.broadcast %cst_23 : f32 to vector<128x128xf32>
    %40 = arith.select %38, %35, %39 : vector<128x128xi1>, vector<128x128xf32>
    %cst_24 = arith.constant dense<0xFF800000> : vector<128xf32>
    %41 = vector.multi_reduction <maximumf>, %40, %cst_24 [1] : vector<128x128xf32> to vector<128xf32>
    %42 = vector.shape_cast %41 : vector<128xf32> to vector<128x1xf32>
    %cst_25 = arith.constant -1.000000e+30 : f32
    %43 = vector.broadcast %cst_25 : f32 to vector<128x128xf32>
    %44 = arith.select %38, %43, %35 : vector<128x128xi1>, vector<128x128xf32>
    %cst_26 = arith.constant dense<0xFF800000> : vector<128xf32>
    %45 = vector.multi_reduction <maximumf>, %44, %cst_26 [1] : vector<128x128xf32> to vector<128xf32>
    %46 = vector.shape_cast %45 : vector<128xf32> to vector<128x1xf32>
    %47 = vector.shape_cast %42 : vector<128x1xf32> to vector<128x1xf32>
    %48 = vector.broadcast %47 : vector<128x1xf32> to vector<128x128xf32>
    %49 = vector.shape_cast %46 : vector<128x1xf32> to vector<128x1xf32>
    %50 = vector.broadcast %49 : vector<128x1xf32> to vector<128x128xf32>
    %51 = arith.select %38, %48, %50 : vector<128x128xi1>, vector<128x128xf32>
    %52 = arith.subf %35, %51 : vector<128x128xf32>
    %53 = math.exp %52 : vector<128x128xf32>
    %cst_27 = arith.constant 0.000000e+00 : f32
    %54 = vector.broadcast %cst_27 : f32 to vector<128x128xf32>
    %55 = arith.select %38, %53, %54 : vector<128x128xi1>, vector<128x128xf32>
    %cst_28 = arith.constant dense<0.000000e+00> : vector<128xf32>
    %56 = vector.multi_reduction <add>, %55, %cst_28 [1] : vector<128x128xf32> to vector<128xf32>
    %57 = vector.shape_cast %56 : vector<128xf32> to vector<128x1xf32>
    %cst_29 = arith.constant 0.000000e+00 : f32
    %58 = vector.broadcast %cst_29 : f32 to vector<128x128xf32>
    %59 = arith.select %38, %58, %53 : vector<128x128xi1>, vector<128x128xf32>
    %cst_30 = arith.constant dense<0.000000e+00> : vector<128xf32>
    %60 = vector.multi_reduction <add>, %59, %cst_30 [1] : vector<128x128xf32> to vector<128xf32>
    %61 = vector.shape_cast %60 : vector<128xf32> to vector<128x1xf32>
    %62 = vector.shape_cast %57 : vector<128x1xf32> to vector<128x1xf32>
    %63 = vector.broadcast %62 : vector<128x1xf32> to vector<128x128xf32>
    %64 = vector.shape_cast %61 : vector<128x1xf32> to vector<128x1xf32>
    %65 = vector.broadcast %64 : vector<128x1xf32> to vector<128x128xf32>
    %66 = arith.select %38, %63, %65 : vector<128x128xi1>, vector<128x128xf32>
    %67 = arith.subf %35, %51 : vector<128x128xf32>
    %68 = math.log %66 : vector<128x128xf32>
    %69 = arith.subf %67, %68 : vector<128x128xf32>
    %c0_31 = arith.constant 0 : index
    %c0_32 = arith.constant 0 : index
    %70 = vector.load %arg10[%c0_31, %c0_32] : memref<128x128xf32, #tpu.memory_space<vmem>>, vector<128x128xf32>
    tpu.vector_store %arg10[%c0_31, %c0_32], %69 {strides = array<i32>} : memref<128x128xf32, #tpu.memory_space<vmem>>, vector<128x128xf32>,
    return
  }
  func.func @transform_0(%arg0: i32) -> (i32, i32) {
    %c0_i32 = arith.constant 0 : i32
    %c0_i32_0 = arith.constant 0 : i32
    %c0_i32_1 = arith.constant 0 : i32
    return %c0_i32, %c0_i32_0 : i32, i32
  }
  func.func @transform_1(%arg0: i32) -> (i32, i32) {
    %c0_i32 = arith.constant 0 : i32
    %c0_i32_0 = arith.constant 0 : i32
    %c0_i32_1 = arith.constant 0 : i32
    return %c0_i32, %c0_i32_0 : i32, i32
  }
  func.func @transform_2(%arg0: i32) -> (i32, i32) {
    %c0_i32 = arith.constant 0 : i32
    %c0_i32_0 = arith.constant 0 : i32
    %c0_i32_1 = arith.constant 0 : i32
    return %c0_i32, %c0_i32_0 : i32, i32
  }
  func.func @transform_3(%arg0: i32) -> (i32, i32) {
    %c0_i32 = arith.constant 0 : i32
    %c0_i32_0 = arith.constant 0 : i32
    %c0_i32_1 = arith.constant 0 : i32
    return %c0_i32, %c0_i32_0 : i32, i32
  }
  func.func @transform_4(%arg0: i32) -> (i32, i32) {
    %c0_i32 = arith.constant 0 : i32
    %c0_i32_0 = arith.constant 0 : i32
    %c0_i32_1 = arith.constant 0 : i32
    return %c0_i32, %c0_i32_0 : i32, i32
  }
  func.func @transform_5(%arg0: i32) -> (i32, i32) {
    %c0_i32 = arith.constant 0 : i32
    %c0_i32_0 = arith.constant 0 : i32
    %c0_i32_1 = arith.constant 0 : i32
    return %c0_i32, %c0_i32_0 : i32, i32
  }
  func.func @transform_6(%arg0: i32) -> (i32, i32) {
    %c0_i32 = arith.constant 0 : i32
    %c0_i32_0 = arith.constant 0 : i32
    %c0_i32_1 = arith.constant 0 : i32
    return %c0_i32, %c0_i32_0 : i32, i32
  }
  func.func @transform_7(%arg0: i32) -> (i32, i32) {
    %c0_i32 = arith.constant 0 : i32
    %c0_i32_0 = arith.constant 0 : i32
    %c0_i32_1 = arith.constant 0 : i32
    return %c0_i32, %c0_i32_0 : i32, i32
  }
  func.func @transform_8(%arg0: i32) -> (i32, i32) {
    %c0_i32 = arith.constant 0 : i32
    %c0_i32_0 = arith.constant 0 : i32
    %c0_i32_1 = arith.constant 0 : i32
    return %c0_i32, %c0_i32_0 : i32, i32
  }
  func.func @transform_9(%arg0: i32) -> (i32, i32) {
    %c0_i32 = arith.constant 0 : i32
    %c0_i32_0 = arith.constant 0 : i32
    %c0_i32_1 = arith.constant 0 : i32
    return %c0_i32, %c0_i32_0 : i32, i32
  }
}

</mosaic_0001>

<bundles_post_ra>
// kernel: _forward_jit.1
= control target key start
LH: loop header
LB: loop body
LE: loop exit
PB: predicated region body
PF: predicated region fallthrough
CT: control target
= control target key end

     0   :  { %v1864_v1 = vmov 0   ;;  %s2691_s3 = inlined_call_operand.vmem [shape: bf16[128,128], index: 3, kind: input, shape index: {}]   ;;  %s2692_s0 = inlined_call_operand.vmem [shape: bf16[128,128], index: 0, kind: input, shape index: {}]   ;;  %s2693_s2 = inlined_call_operand.vmem [shape: f32[128,1], index: 2, kind: input, shape index: {}]   ;;  %s2694_s1 = inlined_call_operand.vmem [shape: bf16[128,128], index: 1, kind: input, shape index: {}]   ;;  %s2695_s5 = inlined_call_operand.vmem [shape: bf16[128,128], index: 5, kind: input, shape index: {}]   ;;  %s2696_s4 = inlined_call_operand.vmem [shape: f32[1,128], index: 4, kind: input, shape index: {}]   ;;  %s2697_s7 = inlined_call_operand.vmem [shape: bf16[128,128], index: 7, kind: input, shape index: {}]   ;;  %s2698_s6 = inlined_call_operand.vmem [shape: f32[1,128], index: 6, kind: input, shape index: {}]   ;;  %s2699_s8 = inlined_call_operand.vmem [shape: f32[1,128], index: 8, kind: input, shape index: {}]   ;;  %s2700_s9 = inlined_call_operand.vmem [shape: f32[128,128], index: 9, kind: output, shape index: {}]  }
   0x1   :  { %v1760_v0 = vld [vmem:[%s2691_s3] sm:$0xff]   ;;  %1758 = vset.pattern.permute.xlu0 %v1864_v1  ;;  %1759 = vset.pattern.permute.xlu1 %v1864_v1  ;;  %v1761_v2 = vld [vmem:[%s2691_s3 + $0x8] sm:$0xff]   ;;  %v1762_v3 = vld [vmem:[%s2691_s3 + $0x10] sm:$0xff]  }
   0x2   :  { %1581 = vmatprep.subr.bf16.mxu0 %v1760_v0  ;;  %v1763_v4 = vld [vmem:[%s2691_s3 + $0x18] sm:$0xff]   ;;  %v1768_v5 = vld [vmem:[%s2692_s0] sm:$0xff]   ;;  %v1765_v7 = vld [vmem:[%s2691_s3 + $0x28] sm:$0xff]  }
   0x3   :  { %1582 = vmatpush3.bf16.msra.mxu0 %v1760_v0  ;;  %1597 = vmatprep.mubr.bf16.mxu0 %v1768_v5  ;;  %v1764_v6 = vld [vmem:[%s2691_s3 + $0x20] sm:$0xff]   ;;  %v35_v9 = vld [vmem:[%s2693_s2 + $0x10] sm:$0xff]  ;;  %v34_v10 = vld [vmem:[%s2693_s2 + $0x8] sm:$0xff] }
   0x4   :  { %1583 = vmatprep.subr.bf16.mxu0 %v1761_v2  ;;  %v33_v8 = vld [vmem:[%s2693_s2] sm:$0xff]  ;;  %302 = vperm.xlu1 %1759, %v35_v9   ;;  %v36_v11 = vld [vmem:[%s2693_s2 + $0x18] sm:$0xff]  ;;  %v1766_v12 = vld [vmem:[%s2691_s3 + $0x30] sm:$0xff]  }
   0x5   :  { %292 = vperm.xlu0 %1758, %v33_v8   ;;  %v37_v13 = vld [vmem:[%s2693_s2 + $0x20] sm:$0xff]  ;;  %v38_v14 = vld [vmem:[%s2693_s2 + $0x28] sm:$0xff]  ;;  %v1767_v15 = vld [vmem:[%s2691_s3 + $0x38] sm:$0xff]  }
   0x6   :  { %v39_v16 = vld [vmem:[%s2693_s2 + $0x30] sm:$0xff]  ;;  %v40_v17 = vld [vmem:[%s2693_s2 + $0x38] sm:$0xff]  ;;  %v1769_v18 = vld [vmem:[%s2692_s0 + $0x8] sm:$0xff]  }
   0x7   :  { %1584 = vmatpush3.bf16.msra.mxu0 %v1761_v2  ;;  %v41_v19 = vld [vmem:[%s2693_s2 + $0x40] sm:$0xff]  ;;  %v42_v20 = vld [vmem:[%s2693_s2 + $0x48] sm:$0xff]  ;;  %v1770_v21 = vld [vmem:[%s2692_s0 + $0x10] sm:$0xff]  }
   0x8   :  { %1585 = vmatprep.subr.bf16.mxu0 %v1762_v3  ;;  %307 = vperm.xlu1 %1759, %v36_v11   ;;  %v43_v22 = vld [vmem:[%s2693_s2 + $0x50] sm:$0xff]  ;;  %v44_v23 = vld [vmem:[%s2693_s2 + $0x58] sm:$0xff]  ;;  %v45_v25 = vld [vmem:[%s2693_s2 + $0x60] sm:$0xff] }
   0x9   :  { %297 = vperm.xlu0 %1758, %v34_v10   ;;  %v1771_v24 = vld [vmem:[%s2692_s0 + $0x18] sm:$0xff]   ;;  %v46_v26 = vld [vmem:[%s2693_s2 + $0x68] sm:$0xff]  ;;  %v1772_v27 = vld [vmem:[%s2692_s0 + $0x20] sm:$0xff]  }
   0xa   :  { %v47_v28 = vld [vmem:[%s2693_s2 + $0x70] sm:$0xff]  ;;  %v48_v29 = vld [vmem:[%s2693_s2 + $0x78] sm:$0xff]  ;;  %v1773_v30 = vld [vmem:[%s2692_s0 + $0x28] sm:$0xff]  }
   0xb   :  { %1586 = vmatpush3.bf16.msra.mxu0 %v1762_v3  ;;  %v1774_v31 = vld [vmem:[%s2692_s0 + $0x30] sm:$0xff]   ;;  %v1775_v32 = vld [vmem:[%s2692_s0 + $0x38] sm:$0xff]   ;;  %v2014_v33 = vld [vmem:[%s2694_s1] sm:$0xff]  }
   0xc   :  { %1587 = vmatprep.subr.bf16.mxu0 %v1763_v4  ;;  %317 = vperm.xlu1 %1759, %v38_v14   ;;  %v1784_v34 = vld [vmem:[%s2695_s5] sm:$0xff]   ;;  %v1785_v35 = vld [vmem:[%s2695_s5 + $0x8] sm:$0xff]   ;;  %v1786_v36 = vld [vmem:[%s2695_s5 + $0x10] sm:$0xff]  }
   0xd   :  { %312 = vperm.xlu0 %1758, %v37_v13   ;;  %1629 = vmatprep.mubr.bf16.mxu1 %v2014_v33  ;;  %v1787_v37 = vld [vmem:[%s2695_s5 + $0x18] sm:$0xff]   ;;  %v1788_v38 = vld [vmem:[%s2695_s5 + $0x20] sm:$0xff]  }
   0xf   :  { %1588 = vmatpush3.bf16.msra.mxu0 %v1763_v4 }
  0x10   :  { %1589 = vmatprep.subr.bf16.mxu0 %v1764_v6  ;;  %327 = vperm.xlu1 %1759, %v40_v17  }
  0x11   :  { %322 = vperm.xlu0 %1758, %v39_v16  }
  0x13   :  { %1590 = vmatpush3.bf16.msra.mxu0 %v1764_v6 }
  0x14   :  { %1591 = vmatprep.subr.bf16.mxu0 %v1765_v7  ;;  %337 = vperm.xlu1 %1759, %v42_v20  }
  0x15   :  { %332 = vperm.xlu0 %1758, %v41_v19  }
  0x17   :  { %1592 = vmatpush3.bf16.msra.mxu0 %v1765_v7 }
  0x18   :  { %1593 = vmatprep.subr.bf16.mxu0 %v1766_v12  ;;  %347 = vperm.xlu1 %1759, %v44_v23  }
  0x19   :  { %342 = vperm.xlu0 %1758, %v43_v22  }
  0x1b   :  { %1594 = vmatpush3.bf16.msra.mxu0 %v1766_v12 }
  0x1c   :  { %1595 = vmatprep.subr.bf16.mxu0 %v1767_v15  ;;  %357 = vperm.xlu1 %1759, %v46_v26  }
  0x1d   :  { %352 = vperm.xlu0 %1758, %v45_v25  }
  0x1f   :  { %1596 = vmatpush3.bf16.msra.mxu0 %v1767_v15 }
  0x20   :  { %367 = vperm.xlu1 %1759, %v48_v29   ;;  %1645 = vmatprep.subr.bf16.mxu0 %v1784_v34 }
  0x21   :  { %362 = vperm.xlu0 %1758, %v47_v28  }
  0x22   :  { %1598 = vmatmul.mubr.bf16.vlgmr.msra.gmra.mrb[0].mxu0 %v1769_v18 }
  0x23   :  { %1601 = vmatprep.mubr.bf16.mxu0 %v1770_v21  ;;  %1646 = vmatpush3.bf16.msra.mxu0 %v1784_v34  ;;  %v2095_v34 = vld [vmem:[%s2694_s1 + $0x18] sm:$0xff]  }
  0x24   :  { %1647 = vmatprep.subr.bf16.mxu0 %v1785_v35 }
  0x27   :  { %1648 = vmatpush3.bf16.msra.mxu0 %v1785_v35  ;;  %v2100_v35 = vld [vmem:[%s2694_s1 + $0x20] sm:$0xff]  }
  0x28   :  { %1649 = vmatprep.subr.bf16.mxu0 %v1786_v36 }
  0x2a   :  { %1602 = vmatmul.mubr.bf16.gmra.mrb[4].mxu0 %v1771_v24 }
  0x2b   :  { %1605 = vmatprep.mubr.bf16.mxu0 %v1772_v27  ;;  %1650 = vmatpush3.bf16.msra.mxu0 %v1786_v36  ;;  %v2107_v36 = vld [vmem:[%s2694_s1 + $0x28] sm:$0xff]  }
  0x2c   :  { %1651 = vmatprep.subr.bf16.mxu0 %v1787_v37 }
  0x2f   :  { %1652 = vmatpush3.bf16.msra.mxu0 %v1787_v37  ;;  %v2112_v37 = vld [vmem:[%s2694_s1 + $0x30] sm:$0xff]  }
  0x30   :  { %1653 = vmatprep.subr.bf16.mxu0 %v1788_v38 }
  0x32   :  { %1606 = vmatmul.mubr.bf16.gmra.mrb[8].mxu0 %v1773_v30 }
  0x33   :  { %1609 = vmatprep.mubr.bf16.mxu0 %v1774_v31  ;;  %1654 = vmatpush3.bf16.msra.mxu0 %v1788_v38  ;;  %v2083_v31 = vld [vmem:[%s2694_s1 + $0x8] sm:$0xff]   ;;  %v2119_v38 = vld [vmem:[%s2694_s1 + $0x38] sm:$0xff]  }
  0x3a   :  { %1610 = vmatmul.mubr.bf16.gmra.mrb[12].mxu0 %v1775_v32  ;;  %v2088_v32 = vld [vmem:[%s2694_s1 + $0x10] sm:$0xff]  }
  0x83   :  { %v2034_v40 = vpop.permute.xlu1 %302 }
  0x84   :  { %v2032_v39 = vpop.permute.xlu0 %292 }
  0x87   :  { %v2038_v42 = vpop.permute.xlu1 %307 }
  0x88   :  { %v2036_v41 = vpop.permute.xlu0 %297 }
  0x8b   :  { %v2042_v44 = vpop.permute.xlu1 %317 }
  0x8c   :  { %v2040_v43 = vpop.permute.xlu0 %312 }
  0x8f   :  { %v2046_v48 = vpop.permute.xlu1 %327 }
  0x90   :  { %v2044_v46 = vpop.permute.xlu0 %322 }
  0x93   :  { %v2054_v58 = vpop.permute.xlu1 %337 }
  0x94   :  { %v2052_v57 = vpop.permute.xlu0 %332 }
  0x97   :  { %v2062_v5 = vpop.permute.xlu1 %347 }
  0x98   :  { %v2060_v3 = vpop.permute.xlu0 %342 }
  0x9b   :  { %v2068_v14 = vpop.permute.xlu1 %357 }
  0x9c   :  { %v2064_v10 = vpop.permute.xlu0 %352 }
  0x9f   :  { %v2074_v22 = vpop.permute.xlu1 %367 }
  0xa0   :  { %v2072_v20 = vpop.permute.xlu0 %362 }
  0xf5   :  { %v1599_v45 = vpop.f32.mrb[0].mxu0 }
  0xf6   :  { %v227_v47 = vpop.f32.mrb[1].mxu0  ;;  %v372_v50 = vmul.f32 %v1599_v45, %v2034_v40  ;;  %v1789_v45 = vld [vmem:[%s2695_s5 + $0x28] sm:$0xff]  }
  0xf7   :  { %v1600_v49 = vpop.f32.mrb[2].mxu0  ;;  %v370_v53 = vmul.f32 %v2032_v39, %v227_v47  ;;  %1655 = vmatprep.subr.bf16.mxu0 %v1789_v45  ;;  %v1790_v47 = vld [vmem:[%s2695_s5 + $0x30] sm:$0xff]  }
  0xf8   :  { %v373_v51 = vmul.f32 %v1600_v49, %v2038_v42  ;;  %v230_v52 = vpop.f32.mrb[3].mxu0  ;;  %1656 = vmatpush3.bf16.msra.mxu0 %v1789_v45  ;;  %v1791_v49 = vld [vmem:[%s2695_s5 + $0x38] sm:$0xff]  }
  0xf9   :  { %v371_v54 = vmul.f32 %v2036_v41, %v230_v52  ;;  %1657 = vmatprep.subr.bf16.mxu0 %v1790_v47 }
  0xfa   :  { %v387_v55 = vpack.c.bf16 %v373_v51, %v372_v50 }
  0xfb   :  { %v386_v56 = vpack.c.bf16 %v371_v54, %v370_v53 }
  0xfc   :  { %1658 = vmatpush3.bf16.msra.mxu0 %v1790_v47 }
  0xfd   :  { %v1603_v59 = vpop.f32.mrb[4].mxu0  ;;  %1613 = vmatprep.subr.bf16.mxu1 %v386_v56  ;;  %1659 = vmatprep.subr.bf16.mxu0 %v1791_v49 }
  0xfe   :  { %v243_v60 = vpop.f32.mrb[5].mxu0  ;;  %1614 = vmatpush3.bf16.msra.mxu1 %v386_v56  ;;  %v376_v62 = vmul.f32 %v1603_v59, %v2044_v46 }
  0xff   :  { %v1604_v61 = vpop.f32.mrb[6].mxu0  ;;  %1615 = vmatprep.subr.bf16.mxu1 %v387_v55  ;;  %v374_v1 = vmul.f32 %v2040_v43, %v243_v60 }
 0x100   :  { %v377_v63 = vmul.f32 %v1604_v61, %v2046_v48  ;;  %v246_v0 = vpop.f32.mrb[7].mxu0  ;;  %1660 = vmatpush3.bf16.msra.mxu0 %v1791_v49 }
 0x101   :  { %v375_v2 = vmul.f32 %v2042_v44, %v246_v0 }
 0x102   :  { %v389_v4 = vpack.c.bf16 %v377_v63, %v376_v62  ;;  %1616 = vmatpush3.bf16.msra.mxu1 %v387_v55 }
 0x103   :  { %v388_v6 = vpack.c.bf16 %v375_v2, %v374_v1 }
 0x105   :  { %v1607_v7 = vpop.f32.mrb[8].mxu0  ;;  %1617 = vmatprep.subr.bf16.mxu1 %v388_v6 }
 0x106   :  { %v259_v8 = vpop.f32.mrb[9].mxu0  ;;  %1618 = vmatpush3.bf16.msra.mxu1 %v388_v6  ;;  %v380_v11 = vmul.f32 %v1607_v7, %v2060_v3 }
 0x107   :  { %v1608_v9 = vpop.f32.mrb[10].mxu0  ;;  %1619 = vmatprep.subr.bf16.mxu1 %v389_v4  ;;  %v378_v15 = vmul.f32 %v2052_v57, %v259_v8 }
 0x108   :  { %v381_v12 = vmul.f32 %v1608_v9, %v2062_v5  ;;  %v262_v13 = vpop.f32.mrb[11].mxu0 }
 0x109   :  { %v379_v16 = vmul.f32 %v2054_v58, %v262_v13 }
 0x10a   :  { %v391_v17 = vpack.c.bf16 %v381_v12, %v380_v11  ;;  %1620 = vmatpush3.bf16.msra.mxu1 %v389_v4 }
 0x10b   :  { %v390_v18 = vpack.c.bf16 %v379_v16, %v378_v15 }
 0x10d   :  { %v1611_v19 = vpop.f32.mrb[12].mxu0  ;;  %1621 = vmatprep.subr.bf16.mxu1 %v390_v18 }
 0x10e   :  { %v275_v21 = vpop.f32.mrb[13].mxu0  ;;  %1622 = vmatpush3.bf16.msra.mxu1 %v390_v18  ;;  %v384_v24 = vmul.f32 %v1611_v19, %v2072_v20 }
 0x10f   :  { %v1612_v23 = vpop.f32.mrb[14].mxu0  ;;  %1623 = vmatprep.subr.bf16.mxu1 %v391_v17  ;;  %v382_v27 = vmul.f32 %v2064_v10, %v275_v21 }
 0x110   :  { %v385_v25 = vmul.f32 %v1612_v23, %v2074_v22  ;;  %v278_v26 = vpop.f32.mrb[15].mxu0 }
 0x111   :  { %v383_v28 = vmul.f32 %v2068_v14, %v278_v26 }
 0x112   :  { %v393_v29 = vpack.c.bf16 %v385_v25, %v384_v24  ;;  %1624 = vmatpush3.bf16.msra.mxu1 %v391_v17 }
 0x113   :  { %v392_v30 = vpack.c.bf16 %v383_v28, %v382_v27 }
 0x115   :  { %1625 = vmatprep.subr.bf16.mxu1 %v392_v30 }
 0x116   :  { %1626 = vmatpush3.bf16.msra.mxu1 %v392_v30 }
 0x117   :  { %1627 = vmatprep.subr.bf16.mxu1 %v393_v29 }
 0x11a   :  { %1628 = vmatpush3.bf16.msra.mxu1 %v393_v29 }
 0x11d   :  { %1630 = vmatmul.mubr.bf16.vlgmr.msra.gmra.mrb[0].mxu1 %v2083_v31 }
 0x11e   :  { %1633 = vmatprep.mubr.bf16.mxu1 %v2088_v32 }
 0x125   :  { %1634 = vmatmul.mubr.bf16.gmra.mrb[4].mxu1 %v2095_v34 }
 0x126   :  { %1637 = vmatprep.mubr.bf16.mxu1 %v2100_v35 }
 0x12d   :  { %1638 = vmatmul.mubr.bf16.gmra.mrb[8].mxu1 %v2107_v36 }
 0x12e   :  { %1641 = vmatprep.mubr.bf16.mxu1 %v2112_v37 }
 0x135   :  { %1642 = vmatmul.mubr.bf16.gmra.mrb[12].mxu1 %v2119_v38 }
 0x136   :  { %1693 = vmatprep.mubr.bf16.mxu1 %v2014_v33  ;;  %v2135_v33 = vld [vmem:[%s2696_s4] ss:$0 sm:$0xff] }
 0x1f0   :  { %v1631_v50 = vpop.f32.mrb[0].mxu1 }
 0x1f1   :  { %v541_v51 = vmul.f32 %v1631_v50, %v2034_v40  ;;  %v476_v52 = vpop.f32.mrb[1].mxu1 }
 0x1f2   :  { %v539_v53 = vmul.f32 %v476_v52, %v2032_v39  ;;  %v1632_v54 = vpop.f32.mrb[2].mxu1 }
 0x1f3   :  { %v564_v55 = vadd.f32 %v2135_v33, %v541_v51  ;;  %v542_v56 = vmul.f32 %v1632_v54, %v2038_v42  ;;  %v479_v59 = vpop.f32.mrb[3].mxu1 }
 0x1f4   :  { %v562_v60 = vadd.f32 %v2135_v33, %v539_v53  ;;  %v540_v61 = vmul.f32 %v479_v59, %v2036_v41 }
 0x1f5   :  { %v565_v62 = vadd.f32 %v2135_v33, %v542_v56  ;;  %v580_v0 = vmax.f32 %v564_v55, 0.0 }
 0x1f6   :  { %v563_v63 = vadd.f32 %v2135_v33, %v540_v61  ;;  %v578_v2 = vmax.f32 %v562_v60, 0.0 }
 0x1f7   :  { %v581_v1 = vmax.f32 %v565_v62, 0.0 }
 0x1f8   :  { %v579_v4 = vmax.f32 %v563_v63, 0.0  ;;  %v1635_v6 = vpop.f32.mrb[4].mxu1 }
 0x1f9   :  { %v595_v7 = vpack.c.bf16 %v581_v1, %v580_v0  ;;  %v545_v8 = vmul.f32 %v1635_v6, %v2044_v46  ;;  %v492_v9 = vpop.f32.mrb[5].mxu1 }
 0x1fa   :  { %v543_v11 = vmul.f32 %v492_v9, %v2040_v43  ;;  %v1636_v12 = vpop.f32.mrb[6].mxu1  ;;  %v594_v13 = vpack.c.bf16 %v579_v4, %v578_v2 }
 0x1fb   :  { %v568_v15 = vadd.f32 %v2135_v33, %v545_v8  ;;  %v546_v16 = vmul.f32 %v1636_v12, %v2046_v48  ;;  %v495_v17 = vpop.f32.mrb[7].mxu1 }
 0x1fc   :  { %v566_v18 = vadd.f32 %v2135_v33, %v543_v11  ;;  %v544_v19 = vmul.f32 %v495_v17, %v2042_v44  ;;  %1661 = vmatprep.mubr.bf16.mxu0 %v594_v13 }
 0x1fd   :  { %v569_v21 = vadd.f32 %v2135_v33, %v546_v16  ;;  %1662 = vmatmul.mubr.bf16.vlgmr.msra.gmra.mrb[16].mxu0 %v595_v7  ;;  %v584_v24 = vmax.f32 %v568_v15, 0.0 }
 0x1fe   :  { %v567_v23 = vadd.f32 %v2135_v33, %v544_v19  ;;  %v582_v26 = vmax.f32 %v566_v18, 0.0 }
 0x1ff   :  { %v585_v25 = vmax.f32 %v569_v21, 0.0 }
 0x200   :  { %v583_v27 = vmax.f32 %v567_v23, 0.0  ;;  %v1639_v28 = vpop.f32.mrb[8].mxu1 }
 0x201   :  { %v549_v29 = vmul.f32 %v1639_v28, %v2060_v3  ;;  %v508_v30 = vpop.f32.mrb[9].mxu1  ;;  %v597_v45 = vpack.c.bf16 %v585_v25, %v584_v24  ;;  %v2192_v28 = vld [vmem:[%s2697_s7 + $0x18] sm:$0xff]  }
 0x202   :  { %v547_v47 = vmul.f32 %v508_v30, %v2052_v57  ;;  %v1640_v49 = vpop.f32.mrb[10].mxu1  ;;  %v596_v50 = vpack.c.bf16 %v583_v27, %v582_v26  ;;  %v2172_v26 = vld [vmem:[%s2697_s7] sm:$0xff]   ;;  %v2177_v27 = vld [vmem:[%s2697_s7 + $0x8] sm:$0xff]  }
 0x203   :  { %v572_v51 = vadd.f32 %v2135_v33, %v549_v29  ;;  %v550_v52 = vmul.f32 %v1640_v49, %v2062_v5  ;;  %v511_v53 = vpop.f32.mrb[11].mxu1  ;;  %1709 = vmatprep.subr.bf16.mxu0 %v2172_v26  ;;  %v2199_v29 = vld [vmem:[%s2697_s7 + $0x20] sm:$0xff]  }
 0x204   :  { %v570_v54 = vadd.f32 %v2135_v33, %v547_v47  ;;  %v548_v55 = vmul.f32 %v511_v53, %v2054_v58  ;;  %1665 = vmatprep.mubr.bf16.mxu0 %v596_v50  ;;  %1710 = vmatpush3.bf16.msra.mxu0 %v2172_v26 }
 0x205   :  { %v573_v56 = vadd.f32 %v2135_v33, %v550_v52  ;;  %1666 = vmatmul.mubr.bf16.gmra.mrb[20].mxu0 %v597_v45  ;;  %v588_v60 = vmax.f32 %v572_v51, 0.0  ;;  %1711 = vmatprep.subr.bf16.mxu0 %v2177_v27 }
 0x206   :  { %v571_v59 = vadd.f32 %v2135_v33, %v548_v55  ;;  %v586_v62 = vmax.f32 %v570_v54, 0.0 }
 0x207   :  { %v589_v61 = vmax.f32 %v573_v56, 0.0 }
 0x208   :  { %v587_v63 = vmax.f32 %v571_v59, 0.0  ;;  %v1643_v0 = vpop.f32.mrb[12].mxu1  ;;  %1712 = vmatpush3.bf16.msra.mxu0 %v2177_v27 }
 0x209   :  { %v553_v1 = vmul.f32 %v1643_v0, %v2072_v20  ;;  %v524_v2 = vpop.f32.mrb[13].mxu1  ;;  %v599_v4 = vpack.c.bf16 %v589_v61, %v588_v60 }
 0x20a   :  { %v551_v6 = vmul.f32 %v524_v2, %v2064_v10  ;;  %v1644_v7 = vpop.f32.mrb[14].mxu1  ;;  %v598_v8 = vpack.c.bf16 %v587_v63, %v586_v62 }
 0x20b   :  { %v576_v9 = vadd.f32 %v2135_v33, %v553_v1  ;;  %v554_v11 = vmul.f32 %v1644_v7, %v2074_v22  ;;  %v527_v12 = vpop.f32.mrb[15].mxu1 }
 0x20c   :  { %v574_v13 = vadd.f32 %v2135_v33, %v551_v6  ;;  %v552_v15 = vmul.f32 %v527_v12, %v2068_v14  ;;  %1669 = vmatprep.mubr.bf16.mxu0 %v598_v8 }
 0x20d   :  { %v577_v16 = vadd.f32 %v2135_v33, %v554_v11  ;;  %1670 = vmatmul.mubr.bf16.gmra.mrb[24].mxu0 %v599_v4  ;;  %v592_v18 = vmax.f32 %v576_v9, 0.0 }
 0x20e   :  { %v575_v17 = vadd.f32 %v2135_v33, %v552_v15  ;;  %v590_v21 = vmax.f32 %v574_v13, 0.0  ;;  %v2185_v33 = vld [vmem:[%s2697_s7 + $0x10] sm:$0xff]  }
 0x20f   :  { %v593_v19 = vmax.f32 %v577_v16, 0.0  ;;  %1713 = vmatprep.subr.bf16.mxu0 %v2185_v33 }
 0x210   :  { %v591_v23 = vmax.f32 %v575_v17, 0.0  ;;  %1714 = vmatpush3.bf16.msra.mxu0 %v2185_v33 }
 0x211   :  { %v601_v24 = vpack.c.bf16 %v593_v19, %v592_v18  ;;  %1715 = vmatprep.subr.bf16.mxu0 %v2192_v28 }
 0x212   :  { %v600_v25 = vpack.c.bf16 %v591_v23, %v590_v21 }
 0x214   :  { %1673 = vmatprep.mubr.bf16.mxu0 %v600_v25  ;;  %1716 = vmatpush3.bf16.msra.mxu0 %v2192_v28 }
 0x215   :  { %1674 = vmatmul.mubr.bf16.gmra.mrb[28].mxu0 %v601_v24  ;;  %1717 = vmatprep.subr.bf16.mxu0 %v2199_v29 }
 0x218   :  { %1718 = vmatpush3.bf16.msra.mxu0 %v2199_v29 }
 0x2d0   :  { %v1663_v30 = vpop.f32.mrb[16].mxu0 }
 0x2d1   :  { %v700_v45 = vpop.f32.mrb[17].mxu0  ;;  %v765_v49 = vmul.f32 %v1663_v30, %v2034_v40 }
 0x2d2   :  { %v1664_v47 = vpop.f32.mrb[18].mxu0  ;;  %v763_v52 = vmul.f32 %v700_v45, %v2032_v39 }
 0x2d3   :  { %v766_v50 = vmul.f32 %v1664_v47, %v2038_v42  ;;  %v703_v51 = vpop.f32.mrb[19].mxu0 }
 0x2d4   :  { %v764_v53 = vmul.f32 %v703_v51, %v2036_v41 }
 0x2d5   :  { %v780_v54 = vpack.c.bf16 %v766_v50, %v765_v49 }
 0x2d6   :  { %v779_v55 = vpack.c.bf16 %v764_v53, %v763_v52 }
 0x2d8   :  { %v1667_v56 = vpop.f32.mrb[20].mxu0  ;;  %1677 = vmatprep.subr.bf16.mxu1 %v779_v55 }
 0x2d9   :  { %v716_v59 = vpop.f32.mrb[21].mxu0  ;;  %1678 = vmatpush3.bf16.msra.mxu1 %v779_v55  ;;  %v769_v61 = vmul.f32 %v1667_v56, %v2044_v46 }
 0x2da   :  { %v1668_v60 = vpop.f32.mrb[22].mxu0  ;;  %1679 = vmatprep.subr.bf16.mxu1 %v780_v54  ;;  %v767_v0 = vmul.f32 %v716_v59, %v2040_v43 }
 0x2db   :  { %v770_v62 = vmul.f32 %v1668_v60, %v2046_v48  ;;  %v719_v63 = vpop.f32.mrb[23].mxu0 }
 0x2dc   :  { %v768_v1 = vmul.f32 %v719_v63, %v2042_v44 }
 0x2dd   :  { %v782_v2 = vpack.c.bf16 %v770_v62, %v769_v61  ;;  %1680 = vmatpush3.bf16.msra.mxu1 %v780_v54 }
 0x2de   :  { %v781_v4 = vpack.c.bf16 %v768_v1, %v767_v0 }
 0x2e0   :  { %v1671_v6 = vpop.f32.mrb[24].mxu0  ;;  %1681 = vmatprep.subr.bf16.mxu1 %v781_v4 }
 0x2e1   :  { %v732_v7 = vpop.f32.mrb[25].mxu0  ;;  %1682 = vmatpush3.bf16.msra.mxu1 %v781_v4  ;;  %v773_v9 = vmul.f32 %v1671_v6, %v2060_v3 }
 0x2e2   :  { %v1672_v8 = vpop.f32.mrb[26].mxu0  ;;  %1683 = vmatprep.subr.bf16.mxu1 %v782_v2  ;;  %v771_v13 = vmul.f32 %v732_v7, %v2052_v57 }
 0x2e3   :  { %v774_v11 = vmul.f32 %v1672_v8, %v2062_v5  ;;  %v735_v12 = vpop.f32.mrb[27].mxu0 }
 0x2e4   :  { %v772_v15 = vmul.f32 %v735_v12, %v2054_v58 }
 0x2e5   :  { %v784_v16 = vpack.c.bf16 %v774_v11, %v773_v9  ;;  %1684 = vmatpush3.bf16.msra.mxu1 %v782_v2 }
 0x2e6   :  { %v783_v17 = vpack.c.bf16 %v772_v15, %v771_v13 }
 0x2e8   :  { %v1675_v18 = vpop.f32.mrb[28].mxu0  ;;  %1685 = vmatprep.subr.bf16.mxu1 %v783_v17 }
 0x2e9   :  { %v748_v19 = vpop.f32.mrb[29].mxu0  ;;  %1686 = vmatpush3.bf16.msra.mxu1 %v783_v17  ;;  %v777_v23 = vmul.f32 %v1675_v18, %v2072_v20 }
 0x2ea   :  { %v1676_v21 = vpop.f32.mrb[30].mxu0  ;;  %1687 = vmatprep.subr.bf16.mxu1 %v784_v16  ;;  %v775_v30 = vmul.f32 %v748_v19, %v2064_v10 }
 0x2eb   :  { %v778_v24 = vmul.f32 %v1676_v21, %v2074_v22  ;;  %v751_v25 = vpop.f32.mrb[31].mxu0 }
 0x2ec   :  { %v776_v45 = vmul.f32 %v751_v25, %v2068_v14 }
 0x2ed   :  { %v786_v47 = vpack.c.bf16 %v778_v24, %v777_v23  ;;  %1688 = vmatpush3.bf16.msra.mxu1 %v784_v16 }
 0x2ee   :  { %v785_v49 = vpack.c.bf16 %v776_v45, %v775_v30 }
 0x2f0   :  { %1689 = vmatprep.subr.bf16.mxu1 %v785_v49 }
 0x2f1   :  { %1690 = vmatpush3.bf16.msra.mxu1 %v785_v49 }
 0x2f2   :  { %1691 = vmatprep.subr.bf16.mxu1 %v786_v47 }
 0x2f5   :  { %1692 = vmatpush3.bf16.msra.mxu1 %v786_v47 }
 0x2f6   :  { %1741 = vmatprep.subr.bf16.mxu1 %v2172_v26 }
 0x2f8   :  { %1694 = vmatmul.mubr.bf16.vlgmr.msra.gmra.mrb[16].mxu1 %v2083_v31  ;;  %v1797_v31 = vld [vmem:[%s2697_s7 + $0x28] sm:$0xff]  }
 0x2f9   :  { %1697 = vmatprep.mubr.bf16.mxu1 %v2088_v32  ;;  %1749 = vmatpush3.bf16.msra.mxu1 %v2172_v26  ;;  %v1798_v32 = vld [vmem:[%s2697_s7 + $0x30] sm:$0xff]  }
 0x2fa   :  { %1742 = vmatprep.subr.bf16.mxu1 %v2177_v27  ;;  %1719 = vmatprep.subr.bf16.mxu0 %v1797_v31 }
 0x2fb   :  { %1720 = vmatpush3.bf16.msra.mxu0 %v1797_v31 }
 0x2fc   :  { %1721 = vmatprep.subr.bf16.mxu0 %v1798_v32 }
 0x2fd   :  { %1750 = vmatpush3.bf16.msra.mxu1 %v2177_v27 }
 0x2fe   :  { %1743 = vmatprep.subr.bf16.mxu1 %v2185_v33 }
 0x2ff   :  { %1722 = vmatpush3.bf16.msra.mxu0 %v1798_v32 }
 0x300   :  { %1698 = vmatmul.mubr.bf16.gmra.mrb[20].mxu1 %v2095_v34  ;;  %v1799_v34 = vld [vmem:[%s2697_s7 + $0x38] sm:$0xff]  }
 0x301   :  { %1701 = vmatprep.mubr.bf16.mxu1 %v2100_v35  ;;  %1751 = vmatpush3.bf16.msra.mxu1 %v2185_v33 }
 0x302   :  { %1744 = vmatprep.subr.bf16.mxu1 %v2192_v28  ;;  %1723 = vmatprep.subr.bf16.mxu0 %v1799_v34 }
 0x303   :  { %1724 = vmatpush3.bf16.msra.mxu0 %v1799_v34 }
 0x305   :  { %1752 = vmatpush3.bf16.msra.mxu1 %v2192_v28 }
 0x306   :  { %1745 = vmatprep.subr.bf16.mxu1 %v2199_v29 }
 0x308   :  { %1702 = vmatmul.mubr.bf16.gmra.mrb[24].mxu1 %v2107_v36  ;;  %v2249_v36 = vld [vmem:[%s2698_s6] ss:$0 sm:$0xff] }
 0x309   :  { %1705 = vmatprep.mubr.bf16.mxu1 %v2112_v37  ;;  %1753 = vmatpush3.bf16.msra.mxu1 %v2199_v29 }
 0x30a   :  { %1746 = vmatprep.subr.bf16.mxu1 %v1797_v31 }
 0x30d   :  { %1754 = vmatpush3.bf16.msra.mxu1 %v1797_v31 }
 0x30e   :  { %1747 = vmatprep.subr.bf16.mxu1 %v1798_v32 }
 0x310   :  { %1706 = vmatmul.mubr.bf16.gmra.mrb[28].mxu1 %v2119_v38 }
 0x311   :  { %1755 = vmatpush3.bf16.msra.mxu1 %v1798_v32 }
 0x312   :  { %1748 = vmatprep.subr.bf16.mxu1 %v1799_v34 }
 0x315   :  { %1756 = vmatpush3.bf16.msra.mxu1 %v1799_v34 }
 0x3cb   :  { %v1695_v35 = vpop.f32.mrb[16].mxu1 }
 0x3cc   :  { %v886_v37 = vmul.f32 %v1695_v35, %v2034_v40  ;;  %v821_v38 = vpop.f32.mrb[17].mxu1 }
 0x3cd   :  { %v884_v26 = vmul.f32 %v821_v38, %v2032_v39  ;;  %v1696_v27 = vpop.f32.mrb[18].mxu1 }
 0x3ce   :  { %v909_v33 = vadd.f32 %v2249_v36, %v886_v37  ;;  %v887_v28 = vmul.f32 %v1696_v27, %v2038_v42  ;;  %v824_v29 = vpop.f32.mrb[19].mxu1 }
 0x3cf   :  { %v907_v50 = vadd.f32 %v2249_v36, %v884_v26  ;;  %v885_v51 = vmul.f32 %v824_v29, %v2036_v41 }
 0x3d0   :  { %v910_v52 = vadd.f32 %v2249_v36, %v887_v28  ;;  %v925_v54 = vmax.f32 %v909_v33, 0.0 }
 0x3d1   :  { %v908_v53 = vadd.f32 %v2249_v36, %v885_v51  ;;  %v923_v40 = vmax.f32 %v907_v50, 0.0 }
 0x3d2   :  { %v926_v55 = vmax.f32 %v910_v52, 0.0 }
 0x3d3   :  { %v924_v56 = vmax.f32 %v908_v53, 0.0  ;;  %v1699_v59 = vpop.f32.mrb[20].mxu1 }
 0x3d4   :  { %v940_v39 = vpack.c.bf16 %v926_v55, %v925_v54  ;;  %v890_v60 = vmul.f32 %v1699_v59, %v2044_v46  ;;  %v837_v61 = vpop.f32.mrb[21].mxu1 }
 0x3d5   :  { %v888_v42 = vmul.f32 %v837_v61, %v2040_v43  ;;  %v1700_v62 = vpop.f32.mrb[22].mxu1  ;;  %v939_v63 = vpack.c.bf16 %v924_v56, %v923_v40 }
 0x3d6   :  { %v913_v0 = vadd.f32 %v2249_v36, %v890_v60  ;;  %v891_v41 = vmul.f32 %v1700_v62, %v2046_v48  ;;  %v840_v1 = vpop.f32.mrb[23].mxu1 }
 0x3d7   :  { %v911_v2 = vadd.f32 %v2249_v36, %v888_v42  ;;  %v889_v4 = vmul.f32 %v840_v1, %v2042_v44  ;;  %1725 = vmatprep.mubr.bf16.mxu0 %v939_v63 }
 0x3d8   :  { %v914_v6 = vadd.f32 %v2249_v36, %v891_v41  ;;  %1726 = vmatmul.mubr.bf16.vlgmr.msra.gmra.mrb[32].mxu0 %v940_v39  ;;  %v929_v7 = vmax.f32 %v913_v0, 0.0 }
 0x3d9   :  { %v912_v46 = vadd.f32 %v2249_v36, %v889_v4  ;;  %v927_v43 = vmax.f32 %v911_v2, 0.0 }
 0x3da   :  { %v930_v8 = vmax.f32 %v914_v6, 0.0 }
 0x3db   :  { %v928_v9 = vmax.f32 %v912_v46, 0.0  ;;  %v1703_v11 = vpop.f32.mrb[24].mxu1 }
 0x3dc   :  { %v894_v12 = vmul.f32 %v1703_v11, %v2060_v3  ;;  %v853_v13 = vpop.f32.mrb[25].mxu1  ;;  %v942_v48 = vpack.c.bf16 %v930_v8, %v929_v7 }
 0x3dd   :  { %v892_v15 = vmul.f32 %v853_v13, %v2052_v57  ;;  %v1704_v16 = vpop.f32.mrb[26].mxu1  ;;  %v941_v17 = vpack.c.bf16 %v928_v9, %v927_v43 }
 0x3de   :  { %v917_v44 = vadd.f32 %v2249_v36, %v894_v12  ;;  %v895_v18 = vmul.f32 %v1704_v16, %v2062_v5  ;;  %v856_v19 = vpop.f32.mrb[27].mxu1 }
 0x3df   :  { %v915_v21 = vadd.f32 %v2249_v36, %v892_v15  ;;  %v893_v23 = vmul.f32 %v856_v19, %v2054_v58  ;;  %1729 = vmatprep.mubr.bf16.mxu0 %v941_v17 }
 0x3e0   :  { %v918_v24 = vadd.f32 %v2249_v36, %v895_v18  ;;  %1730 = vmatmul.mubr.bf16.gmra.mrb[36].mxu0 %v942_v48  ;;  %v933_v25 = vmax.f32 %v917_v44, 0.0 }
 0x3e1   :  { %v916_v3 = vadd.f32 %v2249_v36, %v893_v23  ;;  %v931_v57 = vmax.f32 %v915_v21, 0.0 }
 0x3e2   :  { %v934_v30 = vmax.f32 %v918_v24, 0.0 }
 0x3e3   :  { %v932_v45 = vmax.f32 %v916_v3, 0.0  ;;  %v1707_v47 = vpop.f32.mrb[28].mxu1 }
 0x3e4   :  { %v944_v49 = vpack.c.bf16 %v934_v30, %v933_v25  ;;  %v898_v31 = vmul.f32 %v1707_v47, %v2072_v20  ;;  %v869_v5 = vpop.f32.mrb[29].mxu1 }
 0x3e5   :  { %v896_v32 = vmul.f32 %v869_v5, %v2064_v10  ;;  %v1708_v34 = vpop.f32.mrb[30].mxu1  ;;  %v943_v35 = vpack.c.bf16 %v932_v45, %v931_v57 }
 0x3e6   :  { %v921_v58 = vadd.f32 %v2249_v36, %v898_v31  ;;  %v899_v37 = vmul.f32 %v1708_v34, %v2074_v22  ;;  %v872_v38 = vpop.f32.mrb[31].mxu1  ;;  %v1115_v22 = vlaneseq }
 0x3e7   :  { %v919_v26 = vadd.f32 %v2249_v36, %v896_v32  ;;  %v897_v27 = vmul.f32 %v872_v38, %v2068_v14  ;;  %1733 = vmatprep.mubr.bf16.mxu1 %v943_v35  ;;  %v2288_v14 = vld [vmem:[%s2699_s8] ss:$0 sm:$0xff] }
 0x3e8   :  { %v922_v33 = vadd.f32 %v2249_v36, %v899_v37  ;;  %1734 = vmatmul.mubr.bf16.vlgmr.msra.gmra.mrb[32].mxu1 %v944_v49  ;;  %v937_v28 = vmax.f32 %v921_v58, 0.0  ;;  %v2283_v53 = vand.u32 127, %v1115_v22 }
 0x3e9   :  { %v920_v20 = vadd.f32 %v2249_v36, %v897_v27  ;;  %v935_v10 = vmax.f32 %v919_v26, 0.0 }
 0x3ea   :  { %v938_v29 = vmax.f32 %v922_v33, 0.0  ;;  %vm1117_vm0 = vcmp.lt.s32.totalorder %v2283_v53, 64 }
 0x3eb   :  { %v936_v50 = vmax.f32 %v920_v20, 0.0 }
 0x3ec   :  { %v946_v51 = vpack.c.bf16 %v938_v29, %v937_v28 }
 0x3ed   :  { %v945_v52 = vpack.c.bf16 %v936_v50, %v935_v10 }
 0x3ef   :  { %1737 = vmatprep.mubr.bf16.mxu1 %v945_v52 }
 0x3f0   :  { %1738 = vmatmul.mubr.bf16.gmra.mrb[36].mxu1 %v946_v51 }
 0x4ab   :  { %v1727_v54 = vpop.f32.mrb[32].mxu0 }
 0x4ac   :  { %v2292_v36 = vadd.f32 %v1727_v54, %v2288_v14  ;;  %v1052_v55 = vpop.f32.mrb[33].mxu0 }
 0x4ad   :  { %v1728_v40 = vpop.f32.mrb[34].mxu0  ;;  %v2295_v56 = vadd.f32 %v2288_v14, %v1052_v55 }
 0x4ae   :  { %v1055_v59 = vpop.f32.mrb[35].mxu0  ;;  %v1168_v39 = vsel %vm1117_vm0, -1e+30, %v2292_v36  ;;  %v1120_v60 = vsel %vm1117_vm0, %v2292_v36, -1e+30  ;;  %v2304_v61 = vadd.f32 %v1728_v40, %v2288_v14 }
 0x4af   :  { %1186 = vmax.xlane.f32.xlu1 %v1168_v39  ;;  %1138 = vmax.xlane.f32.xlu0 %v1120_v60  ;;  %v2307_v42 = vadd.f32 %v2288_v14, %v1055_v59  ;;  %v1166_v62 = vsel %vm1117_vm0, -1e+30, %v2295_v56  ;;  %v1118_v63 = vsel %vm1117_vm0, %v2295_v56, -1e+30 }
 0x4b0   :  { %v1121_v46 = vsel %vm1117_vm0, %v2304_v61, -1e+30  ;;  %v1169_v7 = vsel %vm1117_vm0, -1e+30, %v2304_v61 }
 0x4b1   :  { %v1119_v6 = vsel %vm1117_vm0, %v2307_v42, -1e+30  ;;  %v1167_v15 = vsel %vm1117_vm0, -1e+30, %v2307_v42 }
 0x4b3   :  { %1182 = vmax.xlane.f32.xlu1 %v1166_v62  ;;  %1134 = vmax.xlane.f32.xlu0 %v1118_v63  ;;  %v1731_v0 = vpop.f32.mrb[36].mxu0 }
 0x4b4   :  { %v1068_v41 = vpop.f32.mrb[37].mxu0  ;;  %v2316_v2 = vadd.f32 %v1731_v0, %v2288_v14 }
 0x4b5   :  { %v1732_v1 = vpop.f32.mrb[38].mxu0  ;;  %v2331_v12 = vadd.f32 %v2288_v14, %v1068_v41 }
 0x4b6   :  { %v1071_v4 = vpop.f32.mrb[39].mxu0  ;;  %v1124_v8 = vsel %vm1117_vm0, %v2316_v2, -1e+30  ;;  %v2334_v13 = vadd.f32 %v1732_v1, %v2288_v14  ;;  %v1172_v16 = vsel %vm1117_vm0, -1e+30, %v2316_v2 }
 0x4b7   :  { %1136 = vmax.xlane.f32.xlu1 %v1119_v6  ;;  %1140 = vmax.xlane.f32.xlu0 %v1121_v46  ;;  %v1122_v44 = vsel %vm1117_vm0, %v2331_v12, -1e+30  ;;  %v2349_v23 = vadd.f32 %v2288_v14, %v1071_v4  ;;  %v1170_v30 = vsel %vm1117_vm0, -1e+30, %v2331_v12 }
 0x4b8   :  { %v1125_v17 = vsel %vm1117_vm0, %v2334_v13, -1e+30  ;;  %v1173_v25 = vsel %vm1117_vm0, -1e+30, %v2334_v13 }
 0x4b9   :  { %v1123_v57 = vsel %vm1117_vm0, %v2349_v23, -1e+30  ;;  %v1171_v31 = vsel %vm1117_vm0, -1e+30, %v2349_v23 }
 0x4bb   :  { %1188 = vmax.xlane.f32.xlu0 %v1169_v7  ;;  %1146 = vmax.xlane.f32.xlu1 %v1124_v8  ;;  %v1735_v43 = vpop.f32.mrb[32].mxu1 }
 0x4bc   :  { %v1084_v9 = vpop.f32.mrb[33].mxu1  ;;  %v2352_v24 = vadd.f32 %v1735_v43, %v2288_v14 }
 0x4bd   :  { %v1736_v11 = vpop.f32.mrb[34].mxu1  ;;  %v2367_v47 = vadd.f32 %v2288_v14, %v1084_v9 }
 0x4be   :  { %v1087_v48 = vpop.f32.mrb[35].mxu1  ;;  %v1128_v45 = vsel %vm1117_vm0, %v2352_v24, -1e+30  ;;  %v2370_v49 = vadd.f32 %v1736_v11, %v2288_v14  ;;  %v1176_v5 = vsel %vm1117_vm0, -1e+30, %v2352_v24 }
 0x4bf   :  { %1184 = vmax.xlane.f32.xlu0 %v1167_v15  ;;  %1194 = vmax.xlane.f32.xlu1 %v1172_v16  ;;  %v1126_v34 = vsel %vm1117_vm0, %v2367_v47, -1e+30  ;;  %v2385_v35 = vadd.f32 %v2288_v14, %v1087_v48  ;;  %v1174_v38 = vsel %vm1117_vm0, -1e+30, %v2367_v47 }
 0x4c0   :  { %v1129_v32 = vsel %vm1117_vm0, %v2370_v49, -1e+30  ;;  %v1177_v37 = vsel %vm1117_vm0, -1e+30, %v2370_v49 }
 0x4c1   :  { %v1127_v27 = vsel %vm1117_vm0, %v2385_v35, -1e+30  ;;  %v1175_v28 = vsel %vm1117_vm0, -1e+30, %v2385_v35 }
 0x4c3   :  { %1148 = vmax.xlane.f32.xlu0 %v1125_v17  ;;  %1142 = vmax.xlane.f32.xlu1 %v1122_v44  ;;  %v1739_v18 = vpop.f32.mrb[36].mxu1 }
 0x4c4   :  { %v1100_v19 = vpop.f32.mrb[37].mxu1  ;;  %v2388_v58 = vadd.f32 %v1739_v18, %v2288_v14 }
 0x4c5   :  { %v1740_v21 = vpop.f32.mrb[38].mxu1  ;;  %v2397_v26 = vadd.f32 %v2288_v14, %v1100_v19 }
 0x4c6   :  { %v1103_v3 = vpop.f32.mrb[39].mxu1  ;;  %v1132_v33 = vsel %vm1117_vm0, %v2388_v58, -1e+30  ;;  %v2406_v20 = vadd.f32 %v1740_v21, %v2288_v14  ;;  %v1180_v22 = vsel %vm1117_vm0, -1e+30, %v2388_v58 }
 0x4c7   :  { %1196 = vmax.xlane.f32.xlu0 %v1173_v25  ;;  %1190 = vmax.xlane.f32.xlu1 %v1170_v30  ;;  %v1130_v29 = vsel %vm1117_vm0, %v2397_v26, -1e+30  ;;  %v2415_v10 = vadd.f32 %v2288_v14, %v1103_v3  ;;  %v1178_v51 = vsel %vm1117_vm0, -1e+30, %v2397_v26 }
 0x4c8   :  { %v1133_v50 = vsel %vm1117_vm0, %v2406_v20, -1e+30  ;;  %v1181_v54 = vsel %vm1117_vm0, -1e+30, %v2406_v20 }
 0x4c9   :  { %v1131_v52 = vsel %vm1117_vm0, %v2415_v10, -1e+30  ;;  %v1179_v14 = vsel %vm1117_vm0, -1e+30, %v2415_v10 }
 0x4cb   :  { %1144 = vmax.xlane.f32.xlu0 %v1123_v57  ;;  %1154 = vmax.xlane.f32.xlu1 %v1128_v45 }
 0x4cf   :  { %1192 = vmax.xlane.f32.xlu0 %v1171_v31  ;;  %1202 = vmax.xlane.f32.xlu1 %v1176_v5 }
 0x4d3   :  { %1156 = vmax.xlane.f32.xlu0 %v1129_v32  ;;  %1150 = vmax.xlane.f32.xlu1 %v1126_v34 }
 0x4d7   :  { %1204 = vmax.xlane.f32.xlu0 %v1177_v37  ;;  %1198 = vmax.xlane.f32.xlu1 %v1174_v38 }
 0x4db   :  { %1152 = vmax.xlane.f32.xlu0 %v1127_v27  ;;  %1162 = vmax.xlane.f32.xlu1 %v1132_v33 }
 0x4df   :  { %1200 = vmax.xlane.f32.xlu0 %v1175_v28  ;;  %1158 = vmax.xlane.f32.xlu1 %v1130_v29 }
 0x4e3   :  { %1164 = vmax.xlane.f32.xlu0 %v1133_v50  ;;  %1206 = vmax.xlane.f32.xlu1 %v1178_v51 }
 0x4e7   :  { %1160 = vmax.xlane.f32.xlu0 %v1131_v52  ;;  %1210 = vmax.xlane.f32.xlu1 %v1180_v22 }
 0x4eb   :  { %1208 = vmax.xlane.f32.xlu0 %v1179_v14 }
 0x4ef   :  { %1212 = vmax.xlane.f32.xlu0 %v1181_v54 }
 0x53c   :  { %v1187_v55 = vpop.xlane.xlu1 %1186  ;;  %v1139_v40 = vpop.xlane.xlu0 %1138 }
 0x53d   :  { %v1216_v59 = vsel %vm1117_vm0, %v1139_v40, %v1187_v55 }
 0x53e   :  { %v2438_v39 = vsub.f32 %v2292_v36, %v1216_v59 }
 0x540   :  { %v1250_v60 = vmul.f32 1.442695, %v2438_v39  ;;  %v1183_v62 = vpop.xlane.xlu1 %1182  ;;  %v1135_v63 = vpop.xlane.xlu0 %1134 }
 0x541   :  { %v1214_v0 = vsel %vm1117_vm0, %v1135_v63, %v1183_v62 }
 0x542   :  { %1800 = vpow2.f32 %v1250_v60  ;;  %v2444_v41 = vsub.f32 %v2295_v56, %v1214_v0 }
 0x544   :  { %v1246_v1 = vmul.f32 1.442695, %v2444_v41  ;;  %v1137_v4 = vpop.xlane.xlu1 %1136  ;;  %v1141_v6 = vpop.xlane.xlu0 %1140 }
 0x546   :  { %1802 = vpow2.f32 %v1246_v1 }
 0x548   :  { %v1189_v46 = vpop.xlane.xlu0 %1188  ;;  %v1147_v7 = vpop.xlane.xlu1 %1146 }
 0x549   :  { %v1217_v36 = vsel %vm1117_vm0, %v1141_v6, %v1189_v46 }
 0x54a   :  { %v2450_v8 = vsub.f32 %v2304_v61, %v1217_v36 }
 0x54c   :  { %v1801_v43 = vpop.eup %1800  ;;  %v1252_v9 = vmul.f32 1.442695, %v2450_v8  ;;  %v1185_v11 = vpop.xlane.xlu0 %1184 }
 0x54d   :  { %v1195_v48 = vpop.xlane.xlu1 %1194  ;;  %v1215_v56 = vsel %vm1117_vm0, %v1137_v4, %v1185_v11  ;;  %v1280_v16 = vsel %vm1117_vm0, %v1801_v43, 0.0  ;;  %v1328_v3 = vsel %vm1117_vm0, 0.0, %v1801_v43 }
 0x54e   :  { %v1220_v15 = vsel %vm1117_vm0, %v1147_v7, %v1195_v48  ;;  %1804 = vpow2.f32 %v1252_v9  ;;  %v2460_v17 = vsub.f32 %v2307_v42, %v1215_v56  ;;  %1298 = vadd.xlane.f32.xlu1 %v1280_v16 }
 0x54f   :  { %v2463_v61 = vsub.f32 %v2316_v2, %v1220_v15 }
 0x550   :  { %v1248_v44 = vmul.f32 1.442695, %v2460_v17  ;;  %v1149_v19 = vpop.xlane.xlu0 %1148  ;;  %v1803_v25 = vpop.eup %1802 }
 0x551   :  { %v1258_v18 = vmul.f32 1.442695, %v2463_v61  ;;  %v1143_v21 = vpop.xlane.xlu1 %1142  ;;  %v1278_v45 = vsel %vm1117_vm0, %v1803_v25, 0.0  ;;  %v1326_v28 = vsel %vm1117_vm0, 0.0, %v1803_v25 }
 0x552   :  { %1346 = vadd.xlane.f32.xlu1 %v1328_v3 }
 0x553   :  { %1806 = vpow2.f32 %v1258_v18 }
 0x554   :  { %1808 = vpow2.f32 %v1248_v44  ;;  %v1197_v30 = vpop.xlane.xlu0 %1196 }
 0x555   :  { %v1191_v42 = vpop.xlane.xlu1 %1190  ;;  %v1221_v2 = vsel %vm1117_vm0, %v1149_v19, %v1197_v30 }
 0x556   :  { %v1218_v57 = vsel %vm1117_vm0, %v1143_v21, %v1191_v42  ;;  %v2476_v31 = vsub.f32 %v2334_v13, %v1221_v2  ;;  %1294 = vadd.xlane.f32.xlu1 %v1278_v45 }
 0x557   :  { %v2479_v5 = vsub.f32 %v2331_v12, %v1218_v57 }
 0x558   :  { %v1805_v32 = vpop.eup %1804  ;;  %v1260_v34 = vmul.f32 1.442695, %v2476_v31  ;;  %v1145_v38 = vpop.xlane.xlu0 %1144 }
 0x559   :  { %v1254_v37 = vmul.f32 1.442695, %v2479_v5  ;;  %v1155_v27 = vpop.xlane.xlu1 %1154  ;;  %v1281_v33 = vsel %vm1117_vm0, %v1805_v32, 0.0  ;;  %v1329_v52 = vsel %vm1117_vm0, 0.0, %v1805_v32 }
 0x55a   :  { %1300 = vadd.xlane.f32.xlu0 %v1281_v33  ;;  %1342 = vadd.xlane.f32.xlu1 %v1326_v28 }
 0x55b   :  { %1810 = vpow2.f32 %v1254_v37 }
 0x55c   :  { %1812 = vpow2.f32 %v1260_v34  ;;  %v1193_v12 = vpop.xlane.xlu0 %1192 }
 0x55d   :  { %v1203_v13 = vpop.xlane.xlu1 %1202  ;;  %v1807_v29 = vpop.eup %1806  ;;  %v1219_v50 = vsel %vm1117_vm0, %v1145_v38, %v1193_v12 }
 0x55e   :  { %v1224_v51 = vsel %vm1117_vm0, %v1155_v27, %v1203_v13  ;;  %v1809_v22 = vpop.eup %1808  ;;  %v2494_v14 = vsub.f32 %v2349_v23, %v1219_v50  ;;  %1348 = vadd.xlane.f32.xlu0 %v1329_v52  ;;  %v1284_v55 = vsel %vm1117_vm0, %v1807_v29, 0.0  ;;  %v1332_v23 = vsel %vm1117_vm0, 0.0, %v1807_v29 }
 0x55f   :  { %v2497_v54 = vsub.f32 %v2352_v24, %v1224_v51  ;;  %1306 = vadd.xlane.f32.xlu1 %v1284_v55  ;;  %v1279_v63 = vsel %vm1117_vm0, %v1809_v22, 0.0  ;;  %v1327_v46 = vsel %vm1117_vm0, 0.0, %v1809_v22 }
 0x560   :  { %v1256_v40 = vmul.f32 1.442695, %v2494_v14  ;;  %v1157_v60 = vpop.xlane.xlu0 %1156 }
 0x561   :  { %v1266_v59 = vmul.f32 1.442695, %v2497_v54  ;;  %v1151_v62 = vpop.xlane.xlu1 %1150 }
 0x562   :  { %1296 = vadd.xlane.f32.xlu0 %v1279_v63 }
 0x563   :  { %1814 = vpow2.f32 %v1266_v59  ;;  %1354 = vadd.xlane.f32.xlu1 %v1332_v23 }
 0x564   :  { %1816 = vpow2.f32 %v1256_v40  ;;  %v1205_v24 = vpop.xlane.xlu0 %1204 }
 0x565   :  { %v1199_v0 = vpop.xlane.xlu1 %1198  ;;  %v1811_v1 = vpop.eup %1810  ;;  %v1225_v4 = vsel %vm1117_vm0, %v1157_v60, %v1205_v24 }
 0x566   :  { %v1222_v6 = vsel %vm1117_vm0, %v1151_v62, %v1199_v0  ;;  %v1813_v7 = vpop.eup %1812  ;;  %v2514_v36 = vsub.f32 %v2370_v49, %v1225_v4  ;;  %1344 = vadd.xlane.f32.xlu0 %v1327_v46  ;;  %v1282_v9 = vsel %vm1117_vm0, %v1811_v1, 0.0  ;;  %v1330_v49 = vsel %vm1117_vm0, 0.0, %v1811_v1 }
 0x567   :  { %v2517_v43 = vsub.f32 %v2367_v47, %v1222_v6  ;;  %1302 = vadd.xlane.f32.xlu1 %v1282_v9  ;;  %v1285_v16 = vsel %vm1117_vm0, %v1813_v7, 0.0  ;;  %v1333_v21 = vsel %vm1117_vm0, 0.0, %v1813_v7 }
 0x568   :  { %v1268_v11 = vmul.f32 1.442695, %v2514_v36  ;;  %v1153_v56 = vpop.xlane.xlu0 %1152 }
 0x569   :  { %v1262_v48 = vmul.f32 1.442695, %v2517_v43  ;;  %v1163_v15 = vpop.xlane.xlu1 %1162 }
 0x56a   :  { %1308 = vadd.xlane.f32.xlu0 %v1285_v16 }
 0x56b   :  { %1818 = vpow2.f32 %v1262_v48  ;;  %1350 = vadd.xlane.f32.xlu1 %v1330_v49 }
 0x56c   :  { %1820 = vpow2.f32 %v1268_v11  ;;  %v1201_v47 = vpop.xlane.xlu0 %1200 }
 0x56d   :  { %v1159_v44 = vpop.xlane.xlu1 %1158  ;;  %v1815_v18 = vpop.eup %1814  ;;  %v1223_v19 = vsel %vm1117_vm0, %v1153_v56, %v1201_v47 }
 0x56e   :  { %v1817_v3 = vpop.eup %1816  ;;  %v2532_v25 = vsub.f32 %v2385_v35, %v1223_v19  ;;  %1356 = vadd.xlane.f32.xlu0 %v1333_v21  ;;  %v1288_v30 = vsel %vm1117_vm0, %v1815_v18, 0.0  ;;  %v1336_v35 = vsel %vm1117_vm0, 0.0, %v1815_v18 }
 0x56f   :  { %1314 = vadd.xlane.f32.xlu1 %v1288_v30  ;;  %v1283_v32 = vsel %vm1117_vm0, %v1817_v3, 0.0  ;;  %v1331_v28 = vsel %vm1117_vm0, 0.0, %v1817_v3 }
 0x570   :  { %v1264_v42 = vmul.f32 1.442695, %v2532_v25  ;;  %v1165_v2 = vpop.xlane.xlu0 %1164 }
 0x571   :  { %v1207_v57 = vpop.xlane.xlu1 %1206 }
 0x572   :  { %v1226_v45 = vsel %vm1117_vm0, %v1159_v44, %v1207_v57  ;;  %1304 = vadd.xlane.f32.xlu0 %v1283_v32  ;;  %1822 = vpow2.f32 %v1264_v42 }
 0x573   :  { %1362 = vadd.xlane.f32.xlu1 %v1336_v35  ;;  %v2544_v34 = vsub.f32 %v2397_v26, %v1226_v45 }
 0x574   :  { %v1161_v37 = vpop.xlane.xlu0 %1160 }
 0x575   :  { %v1211_v38 = vpop.xlane.xlu1 %1210  ;;  %v1819_v27 = vpop.eup %1818  ;;  %v1270_v26 = vmul.f32 1.442695, %v2544_v34 }
 0x576   :  { %v1228_v33 = vsel %vm1117_vm0, %v1163_v15, %v1211_v38  ;;  %v1821_v12 = vpop.eup %1820  ;;  %1352 = vadd.xlane.f32.xlu0 %v1331_v28  ;;  %v1286_v29 = vsel %vm1117_vm0, %v1819_v27, 0.0 }
 0x577   :  { %v2551_v13 = vsub.f32 %v2388_v58, %v1228_v33  ;;  %1310 = vadd.xlane.f32.xlu1 %v1286_v29  ;;  %v1289_v22 = vsel %vm1117_vm0, %v1821_v12, 0.0  ;;  %v1334_v58 = vsel %vm1117_vm0, 0.0, %v1819_v27  ;;  %v1337_v60 = vsel %vm1117_vm0, 0.0, %v1821_v12 }
 0x578   :  { %v1209_v51 = vpop.xlane.xlu0 %1208 }
 0x579   :  { %v1274_v50 = vmul.f32 1.442695, %v2551_v13  ;;  %v1227_v52 = vsel %vm1117_vm0, %v1161_v37, %v1209_v51 }
 0x57a   :  { %1316 = vadd.xlane.f32.xlu0 %v1289_v22  ;;  %v2564_v55 = vsub.f32 %v2415_v10, %v1227_v52 }
 0x57b   :  { %1824 = vpow2.f32 %v1274_v50  ;;  %1358 = vadd.xlane.f32.xlu1 %v1334_v58 }
 0x57c   :  { %1826 = vpow2.f32 %v1270_v26  ;;  %v1213_v40 = vpop.xlane.xlu0 %1212  ;;  %v1823_v62 = vpop.eup %1822  ;;  %v1272_v23 = vmul.f32 1.442695, %v2564_v55 }
 0x57d   :  { %v1229_v59 = vsel %vm1117_vm0, %v1165_v2, %v1213_v40  ;;  %v1287_v10 = vsel %vm1117_vm0, %v1823_v62, 0.0  ;;  %v1335_v1 = vsel %vm1117_vm0, 0.0, %v1823_v62 }
 0x57e   :  { %v2571_v63 = vsub.f32 %v2406_v20, %v1229_v59  ;;  %1364 = vadd.xlane.f32.xlu0 %v1337_v60 }
 0x580   :  { %v1276_v24 = vmul.f32 1.442695, %v2571_v63 }
 0x582   :  { %1828 = vpow2.f32 %v1276_v24  ;;  %1312 = vadd.xlane.f32.xlu0 %v1287_v10 }
 0x583   :  { %1830 = vpow2.f32 %v1272_v23 }
 0x585   :  { %v1825_v0 = vpop.eup %1824 }
 0x586   :  { %v1292_v4 = vsel %vm1117_vm0, %v1825_v0, 0.0  ;;  %v1827_v20 = vpop.eup %1826  ;;  %1360 = vadd.xlane.f32.xlu0 %v1335_v1  ;;  %v1340_v56 = vsel %vm1117_vm0, 0.0, %v1825_v0 }
 0x587   :  { %1322 = vadd.xlane.f32.xlu1 %v1292_v4  ;;  %v1290_v6 = vsel %vm1117_vm0, %v1827_v20, 0.0  ;;  %v1338_v9 = vsel %vm1117_vm0, 0.0, %v1827_v20 }
 0x58b   :  { %1318 = vadd.xlane.f32.xlu1 %v1290_v6 }
 0x58c   :  { %v1829_v46 = vpop.eup %1828 }
 0x58d   :  { %v1293_v7 = vsel %vm1117_vm0, %v1829_v46, 0.0  ;;  %v1831_v11 = vpop.eup %1830  ;;  %v1341_v16 = vsel %vm1117_vm0, 0.0, %v1829_v46 }
 0x58e   :  { %1324 = vadd.xlane.f32.xlu0 %v1293_v7  ;;  %v1291_v48 = vsel %vm1117_vm0, %v1831_v11, 0.0  ;;  %v1339_v15 = vsel %vm1117_vm0, 0.0, %v1831_v11 }
 0x58f   :  { %1366 = vadd.xlane.f32.xlu1 %v1338_v9 }
 0x592   :  { %1320 = vadd.xlane.f32.xlu0 %v1291_v48 }
 0x593   :  { %1370 = vadd.xlane.f32.xlu1 %v1340_v56 }
 0x596   :  { %1368 = vadd.xlane.f32.xlu0 %v1339_v15 }
 0x59a   :  { %1372 = vadd.xlane.f32.xlu0 %v1341_v16 }
 0x5db   :  { %v1299_v49 = vpop.xlane.xlu1 %1298 }
 0x5df   :  { %v1347_v47 = vpop.xlane.xlu1 %1346 }
 0x5e0   :  { %v1376_v44 = vsel %vm1117_vm0, %v1299_v49, %v1347_v47 }
 0x5e1   :  { %1832 = vlog2.f32 %v1376_v44 }
 0x5e3   :  { %v1295_v18 = vpop.xlane.xlu1 %1294 }
 0x5e7   :  { %v1301_v19 = vpop.xlane.xlu0 %1300  ;;  %v1343_v21 = vpop.xlane.xlu1 %1342 }
 0x5e8   :  { %v1374_v3 = vsel %vm1117_vm0, %v1295_v18, %v1343_v21 }
 0x5e9   :  { %1834 = vlog2.f32 %v1374_v3 }
 0x5eb   :  { %v1833_v30 = vpop.eup %1832  ;;  %v1349_v42 = vpop.xlane.xlu0 %1348 }
 0x5ec   :  { %v1395_v2 = vmul.f32 0.6931472, %v1833_v30  ;;  %v1377_v57 = vsel %vm1117_vm0, %v1301_v19, %v1349_v42  ;;  %v1307_v45 = vpop.xlane.xlu1 %1306 }
 0x5ed   :  { %1836 = vlog2.f32 %v1377_v57 }
 0x5ee   :  { %v1424_v32 = vsub.f32 %v2438_v39, %v1395_v2 }
 0x5ef   :  { %v1297_v35 = vpop.xlane.xlu0 %1296 }
 0x5f0   :  { %1440 = vst [vmem:[%s2700_s9 + $0x10] sm:$0xff] %v1424_v32  ;;  %v1355_v37 = vpop.xlane.xlu1 %1354 }
 0x5f1   :  { %v1380_v38 = vsel %vm1117_vm0, %v1307_v45, %v1355_v37 }
 0x5f2   :  { %1838 = vlog2.f32 %v1380_v38 }
 0x5f3   :  { %v1835_v27 = vpop.eup %1834  ;;  %v1345_v33 = vpop.xlane.xlu0 %1344 }
 0x5f4   :  { %v1391_v28 = vmul.f32 0.6931472, %v1835_v27  ;;  %v1375_v12 = vsel %vm1117_vm0, %v1297_v35, %v1345_v33  ;;  %v1303_v29 = vpop.xlane.xlu1 %1302 }
 0x5f5   :  { %1840 = vlog2.f32 %v1375_v12 }
 0x5f6   :  { %v1422_v39 = vsub.f32 %v2444_v41, %v1391_v28 }
 0x5f7   :  { %v1837_v26 = vpop.eup %1836  ;;  %v1309_v50 = vpop.xlane.xlu0 %1308 }
 0x5f8   :  { %1438 = vst [vmem:[%s2700_s9] sm:$0xff] %v1422_v39  ;;  %v1397_v51 = vmul.f32 0.6931472, %v1837_v26  ;;  %v1351_v52 = vpop.xlane.xlu1 %1350 }
 0x5f9   :  { %v1378_v22 = vsel %vm1117_vm0, %v1303_v29, %v1351_v52 }
 0x5fa   :  { %v1425_v58 = vsub.f32 %v2450_v8, %v1397_v51  ;;  %1842 = vlog2.f32 %v1378_v22 }
 0x5fb   :  { %v1357_v40 = vpop.xlane.xlu0 %1356 }
 0x5fc   :  { %v1839_v59 = vpop.eup %1838  ;;  %1441 = vst [vmem:[%s2700_s9 + $0x18] sm:$0xff] %v1425_v58  ;;  %v1381_v41 = vsel %vm1117_vm0, %v1309_v50, %v1357_v40  ;;  %v1315_v60 = vpop.xlane.xlu1 %1314 }
 0x5fd   :  { %v1403_v62 = vmul.f32 0.6931472, %v1839_v59  ;;  %1844 = vlog2.f32 %v1381_v41 }
 0x5ff   :  { %v1841_v23 = vpop.eup %1840  ;;  %v1428_v24 = vsub.f32 %v2463_v61, %v1403_v62  ;;  %v1305_v10 = vpop.xlane.xlu0 %1304 }
 0x600   :  { %v1393_v0 = vmul.f32 0.6931472, %v1841_v23  ;;  %v1363_v1 = vpop.xlane.xlu1 %1362 }
 0x601   :  { %1444 = vst [vmem:[%s2700_s9 + $0x30] sm:$0xff] %v1428_v24  ;;  %v1384_v8 = vsel %vm1117_vm0, %v1315_v60, %v1363_v1 }
 0x602   :  { %v1423_v4 = vsub.f32 %v2460_v17, %v1393_v0  ;;  %1846 = vlog2.f32 %v1384_v8 }
 0x603   :  { %v1353_v20 = vpop.xlane.xlu0 %1352 }
 0x604   :  { %v1843_v6 = vpop.eup %1842  ;;  %1439 = vst [vmem:[%s2700_s9 + $0x8] sm:$0xff] %v1423_v4  ;;  %v1379_v61 = vsel %vm1117_vm0, %v1305_v10, %v1353_v20  ;;  %v1311_v46 = vpop.xlane.xlu1 %1310 }
 0x605   :  { %v1399_v7 = vmul.f32 0.6931472, %v1843_v6  ;;  %1848 = vlog2.f32 %v1379_v61 }
 0x607   :  { %v1845_v9 = vpop.eup %1844  ;;  %v1426_v11 = vsub.f32 %v2479_v5, %v1399_v7  ;;  %v1317_v48 = vpop.xlane.xlu0 %1316 }
 0x608   :  { %v1405_v56 = vmul.f32 0.6931472, %v1845_v9  ;;  %v1359_v15 = vpop.xlane.xlu1 %1358 }
 0x609   :  { %1442 = vst [vmem:[%s2700_s9 + $0x20] sm:$0xff] %v1426_v11  ;;  %v1382_v17 = vsel %vm1117_vm0, %v1311_v46, %v1359_v15 }
 0x60a   :  { %v1429_v16 = vsub.f32 %v2476_v31, %v1405_v56  ;;  %1850 = vlog2.f32 %v1382_v17 }
 0x60b   :  { %v1365_v49 = vpop.xlane.xlu0 %1364 }
 0x60c   :  { %v1847_v47 = vpop.eup %1846  ;;  %1445 = vst [vmem:[%s2700_s9 + $0x38] sm:$0xff] %v1429_v16  ;;  %v1385_v5 = vsel %vm1117_vm0, %v1317_v48, %v1365_v49 }
 0x60d   :  { %v1411_v44 = vmul.f32 0.6931472, %v1847_v47  ;;  %1852 = vlog2.f32 %v1385_v5 }
 0x60f   :  { %v1849_v18 = vpop.eup %1848  ;;  %v1432_v19 = vsub.f32 %v2497_v54, %v1411_v44  ;;  %v1313_v21 = vpop.xlane.xlu0 %1312 }
 0x610   :  { %v1401_v3 = vmul.f32 0.6931472, %v1849_v18 }
 0x611   :  { %1448 = vst [vmem:[%s2700_s9 + $0x50] sm:$0xff] %v1432_v19 }
 0x612   :  { %v1427_v31 = vsub.f32 %v2494_v14, %v1401_v3 }
 0x613   :  { %v1361_v30 = vpop.xlane.xlu0 %1360 }
 0x614   :  { %v1323_v42 = vpop.xlane.xlu1 %1322  ;;  %v1851_v2 = vpop.eup %1850  ;;  %1443 = vst [vmem:[%s2700_s9 + $0x28] sm:$0xff] %v1427_v31  ;;  %v1383_v57 = vsel %vm1117_vm0, %v1313_v21, %v1361_v30 }
 0x615   :  { %v1407_v45 = vmul.f32 0.6931472, %v1851_v2  ;;  %1854 = vlog2.f32 %v1383_v57 }
 0x617   :  { %v1853_v54 = vpop.eup %1852  ;;  %v1430_v32 = vsub.f32 %v2517_v43, %v1407_v45 }
 0x618   :  { %v1319_v35 = vpop.xlane.xlu1 %1318  ;;  %v1413_v37 = vmul.f32 0.6931472, %v1853_v54 }
 0x619   :  { %1446 = vst [vmem:[%s2700_s9 + $0x40] sm:$0xff] %v1430_v32 }
 0x61a   :  { %v1433_v14 = vsub.f32 %v2514_v36, %v1413_v37 }
 0x61b   :  { %v1325_v38 = vpop.xlane.xlu0 %1324 }
 0x61c   :  { %v1367_v27 = vpop.xlane.xlu1 %1366  ;;  %1449 = vst [vmem:[%s2700_s9 + $0x58] sm:$0xff] %v1433_v14 }
 0x61d   :  { %v1386_v33 = vsel %vm1117_vm0, %v1319_v35, %v1367_v27 }
 0x61e   :  { %1856 = vlog2.f32 %v1386_v33 }
 0x61f   :  { %v1855_v28 = vpop.eup %1854  ;;  %v1321_v43 = vpop.xlane.xlu0 %1320 }
 0x620   :  { %v1371_v12 = vpop.xlane.xlu1 %1370  ;;  %v1409_v29 = vmul.f32 0.6931472, %v1855_v28 }
 0x621   :  { %v1388_v39 = vsel %vm1117_vm0, %v1323_v42, %v1371_v12 }
 0x622   :  { %1858 = vlog2.f32 %v1388_v39  ;;  %v1431_v36 = vsub.f32 %v2532_v25, %v1409_v29 }
 0x623   :  { %v1369_v26 = vpop.xlane.xlu0 %1368 }
 0x624   :  { %1447 = vst [vmem:[%s2700_s9 + $0x48] sm:$0xff] %v1431_v36  ;;  %v1387_v50 = vsel %vm1117_vm0, %v1321_v43, %v1369_v26 }
 0x625   :  { %1860 = vlog2.f32 %v1387_v50 }
 0x627   :  { %v1373_v52 = vpop.xlane.xlu0 %1372 }
 0x628   :  { %v1857_v51 = vpop.eup %1856  ;;  %v1389_v58 = vsel %vm1117_vm0, %v1325_v38, %v1373_v52 }
 0x629   :  { %v1415_v22 = vmul.f32 0.6931472, %v1857_v51  ;;  %1862 = vlog2.f32 %v1389_v58 }
 0x62b   :  { %v1434_v40 = vsub.f32 %v2544_v34, %v1415_v22 }
 0x62c   :  { %v1859_v59 = vpop.eup %1858 }
 0x62d   :  { %1450 = vst [vmem:[%s2700_s9 + $0x60] sm:$0xff] %v1434_v40  ;;  %v1419_v25 = vmul.f32 0.6931472, %v1859_v59 }
 0x62f   :  { %v1436_v41 = vsub.f32 %v2551_v13, %v1419_v25  ;;  %v1861_v60 = vpop.eup %1860 }
 0x630   :  { %v1417_v62 = vmul.f32 0.6931472, %v1861_v60 }
 0x631   :  { %1452 = vst [vmem:[%s2700_s9 + $0x70] sm:$0xff] %v1436_v41 }
 0x632   :  { %v1435_v53 = vsub.f32 %v2564_v55, %v1417_v62 }
 0x633   :  { %v1863_v23 = vpop.eup %1862 }
 0x634   :  { %1451 = vst [vmem:[%s2700_s9 + $0x68] sm:$0xff] %v1435_v53  ;;  %v1421_v34 = vmul.f32 0.6931472, %v1863_v23 }
 0x636   :  { %v1437_v24 = vsub.f32 %v2571_v63, %v1421_v34 }
 0x638   :  { %1453 = vst [vmem:[%s2700_s9 + $0x78] sm:$0xff] %v1437_v24 }

</bundles_post_ra>
